<compile_context>
chip_gen: v7x
topology: tpu7x:2x2x1
jax: 0.10.0
libtpu: 0.0.40
codegen_flags: <defaults>
</compile_context>

<pallas_src>
import functools

import jax
import jax.numpy as jnp
from jax.experimental import pallas as pl
from jax.experimental.pallas import tpu as pltpu


def _round_up(x, m):
    return ((x + m - 1) // m) * m


def actor_critic_eval_kernel(
    obs_ref, act_ref,
    w_sh_ref, b_sh_ref,      # shared trunk:        [D, H] bf16, [1, H] f32
    w_h1_ref, b_h1_ref,      # fused hidden layer:  [H, 2H] bf16, [1, 2H] f32
    w_h2_ref, b_h2_ref,      # fused output layer:  [2H, A+1] bf16, [1, A+1] f32
    out_ref,                 # packed lane-dense output: [TB, 128] f32
):
    TB = obs_ref.shape[0]
    A = w_h2_ref.shape[1] - 1

    obs = obs_ref[...]                                     # [TB, D] bf16

    # ---- shared model: Linear + Tanh (bf16 MXU, f32 accumulate/elementwise) --
    feat = jnp.tanh(
        jnp.dot(obs, w_sh_ref[...], preferred_element_type=jnp.float32)
        + b_sh_ref[...]
    )                                                      # [TB, H] f32

    # ---- fused actor/critic hidden layers: one matmul, one tanh --------------
    h = jnp.tanh(
        jnp.dot(feat.astype(w_h1_ref.dtype), w_h1_ref[...],
                preferred_element_type=jnp.float32)
        + b_h1_ref[...]
    )                                                      # [TB, 2H] f32

    # ---- fused actor/critic output layers (block-diagonal weights) -----------
    out2 = (
        jnp.dot(h.astype(w_h2_ref.dtype), w_h2_ref[...],
                preferred_element_type=jnp.float32)
        + b_h2_ref[...]
    )                                                      # [TB, A+1] f32
    logits = out2[:, :A]                                   # [TB, A]
    value = out2[:, A:A + 1]                               # [TB, 1]

    # ---- Categorical(softmax(logits)): log_prob(action), entropy -------------
    m = jnp.max(logits, axis=-1, keepdims=True)
    shift = logits - m
    e = jnp.exp(shift)                                     # EUP
    denom = jnp.sum(e, axis=-1, keepdims=True)
    log_denom = jnp.log(denom)                             # EUP
    log_probs = shift - log_denom                          # log softmax

    act = act_ref[...]                                     # [TB, 1] int32
    onehot = jax.lax.broadcasted_iota(jnp.int32, (TB, A), 1) == act
    logprob = jnp.sum(jnp.where(onehot, log_probs, 0.0), axis=-1, keepdims=True)

    # entropy = -sum(p*logp) = log(Z) - sum(e*shift)/Z  (no probs tile needed)
    entropy = log_denom - (
        jnp.sum(e * shift, axis=-1, keepdims=True)
        * pl.reciprocal(denom, approx=True)                # EUP vrcp
    )

    # ---- pack the three per-row scalars into one lane-dense tile -------------
    lane = jax.lax.broadcasted_iota(jnp.int32, (TB, out_ref.shape[1]), 1)
    packed = jnp.where(lane == 0, value, 0.0)
    packed = jnp.where(lane == 1, logprob, packed)
    packed = jnp.where(lane == 2, entropy, packed)
    out_ref[...] = packed


@functools.partial(jax.jit, static_argnames=("block_batch", "weight_dtype"))
def actor_critic_evaluate(obs, action, params, *, block_batch=512,
                          weight_dtype=jnp.bfloat16):
    """Returns (value [B,1], logprob [B], entropy [B]) like ActorCritic.evaluate."""
    B, D = obs.shape
    H = params["w_sh"].shape[1]
    A = params["w_a2"].shape[1]

    # ---- batch tiling (sublane aligned); pad B up to a multiple of the tile --
    TB = min(_round_up(int(block_batch), 8), _round_up(B, 8))
    B_pad = _round_up(B, TB)

    obs_p = obs.astype(weight_dtype)                       # halve obs HBM traffic
    act_p = action.astype(jnp.int32).reshape(B, 1)
    if B_pad != B:
        obs_p = jnp.pad(obs_p, ((0, B_pad - B), (0, 0)))
        act_p = jnp.pad(act_p, ((0, B_pad - B), (0, 0)))

    # ---- fuse actor/critic weights (done once in the wrapper) ----------------
    w_sh = params["w_sh"].astype(weight_dtype)             # [D, H]
    b_sh = params["b_sh"].astype(jnp.float32)              # [1, H]
    w_h1 = jnp.concatenate([params["w_a1"], params["w_c1"]], axis=1
                           ).astype(weight_dtype)          # [H, 2H]
    b_h1 = jnp.concatenate([params["b_a1"], params["b_c1"]], axis=1
                           ).astype(jnp.float32)           # [1, 2H]
    w_h2 = jnp.zeros((2 * H, A + 1), jnp.float32)          # block-diagonal pack
    w_h2 = w_h2.at[:H, :A].set(params["w_a2"])
    w_h2 = w_h2.at[H:, A].set(params["w_c2"][:, 0])
    w_h2 = w_h2.astype(weight_dtype)                       # [2H, A+1]
    b_h2 = jnp.concatenate([params["b_a2"], params["b_c2"]], axis=1
                           ).astype(jnp.float32)           # [1, A+1]

    OUT_LANES = 128                                        # lane-dense packed output
    grid = (B_pad // TB,)

    def batch_map(i):
        return (i, 0)

    def const_map(i):                                      # weights resident in VMEM
        return (0, 0)

    out = pl.pallas_call(
        actor_critic_eval_kernel,
        out_shape=jax.ShapeDtypeStruct((B_pad, OUT_LANES), jnp.float32),
        grid=grid,
        in_specs=[
            pl.BlockSpec((TB, D), batch_map),              # obs stream
            pl.BlockSpec((TB, 1), batch_map),              # action stream
            pl.BlockSpec(w_sh.shape, const_map),
            pl.BlockSpec(b_sh.shape, const_map),
            pl.BlockSpec(w_h1.shape, const_map),
            pl.BlockSpec(b_h1.shape, const_map),
            pl.BlockSpec(w_h2.shape, const_map),
            pl.BlockSpec(b_h2.shape, const_map),
        ],
        out_specs=pl.BlockSpec((TB, OUT_LANES), batch_map),
        compiler_params=pltpu.CompilerParams(
            dimension_semantics=("parallel",)),            # megacore-shardable batch
    )(obs_p, act_p, w_sh, b_sh, w_h1, b_h1, w_h2, b_h2)

    value = out[:B, 0:1]
    logprob = out[:B, 1]
    entropy = out[:B, 2]
    return value, logprob, entropy


def init_params(key, obs_dim, hidden_dim, n_actions):
    ks = jax.random.split(key, 12)

    def lin(kw, kb, fan_in, fan_out):
        bound = 1.0 / jnp.sqrt(fan_in)
        w = jax.random.uniform(kw, (fan_in, fan_out), jnp.float32, -bound, bound)
        b = jax.random.uniform(kb, (1, fan_out), jnp.float32, -bound, bound)
        return w, b

    w_sh, b_sh = lin(ks[0], ks[1], obs_dim, hidden_dim)
    w_a1, b_a1 = lin(ks[2], ks[3], hidden_dim, hidden_dim)
    w_a2, b_a2 = lin(ks[4], ks[5], hidden_dim, n_actions)
    w_c1, b_c1 = lin(ks[6], ks[7], hidden_dim, hidden_dim)
    w_c2, b_c2 = lin(ks[8], ks[9], hidden_dim, 1)
    return dict(w_sh=w_sh, b_sh=b_sh,
                w_a1=w_a1, b_a1=b_a1, w_a2=w_a2, b_a2=b_a2,
                w_c1=w_c1, b_c1=b_c1, w_c2=w_c2, b_c2=b_c2)


def reference_evaluate(obs, action, p, *, matmul_dtype=jnp.float32):
    """Pure-JAX reference. matmul_dtype=bf16 mirrors the kernel's mixed precision."""
    def mm(x, w):
        return jnp.dot(x.astype(matmul_dtype), w.astype(matmul_dtype),
                       preferred_element_type=jnp.float32)

    feat = jnp.tanh(mm(obs, p["w_sh"]) + p["b_sh"])
    value = mm(jnp.tanh(mm(feat, p["w_c1"]) + p["b_c1"]), p["w_c2"]) + p["b_c2"]
    logits = mm(jnp.tanh(mm(feat, p["w_a1"]) + p["b_a1"]), p["w_a2"]) + p["b_a2"]
    logp = jax.nn.log_softmax(logits, axis=-1)
    probs = jnp.exp(logp)
    lp = jnp.take_along_axis(logp, action[:, None].astype(jnp.int32), axis=-1)[:, 0]
    ent = -jnp.sum(probs * logp, axis=-1)
    return value, lp, ent


if __name__ == "__main__":
    B, OBS_DIM, HIDDEN, N_ACT = 512, 16, 32, 8
    TB = 128                                               # grid of 4 batch tiles

    key = jax.random.PRNGKey(0)
    k_obs, k_act, k_par = jax.random.split(key, 3)

    obs = jax.random.normal(k_obs, (B, OBS_DIM), jnp.float32)
    action = jax.random.randint(k_act, (B,), 0, N_ACT, jnp.int32)
    params = init_params(k_par, OBS_DIM, HIDDEN, N_ACT)

    value, logprob, entropy = actor_critic_evaluate(obs, action, params,
                                                    block_batch=TB)
    jax.block_until_ready((value, logprob, entropy))

    # Tight check vs. a reference using the SAME mixed precision as the kernel
    # (bf16 matmul inputs, f32 accumulation); entropy gets a slightly looser
    # tolerance because of the approx (EUP) reciprocal.
    v_mx, lp_mx, ent_mx = reference_evaluate(obs, action, params,
                                             matmul_dtype=jnp.bfloat16)
    assert jnp.allclose(value, v_mx, atol=2e-3, rtol=2e-3), "value mismatch (mixed ref)"
    assert jnp.allclose(logprob, lp_mx, atol=2e-3, rtol=2e-3), "logprob mismatch (mixed ref)"
    assert jnp.allclose(entropy, ent_mx, atol=5e-3, rtol=5e-3), "entropy mismatch (mixed ref)"

    # Loose check vs. the full-f32 reference (bf16 weight-quantization tolerance).
    v32, lp32, ent32 = reference_evaluate(obs, action, params)
    assert jnp.allclose(value, v32, atol=1.5e-1), "value mismatch (f32 ref)"
    assert jnp.allclose(logprob, lp32, atol=1.5e-1), "logprob mismatch (f32 ref)"
    assert jnp.allclose(entropy, ent32, atol=1.5e-1), "entropy mismatch (f32 ref)"

    # TODO(synk): act() requires Categorical/MultivariateNormal *sampling*;
    # stochastic sampling is left outside the kernel (could use pltpu.prng_*).
    print("KERNEL_OK")
</pallas_src>

<mosaic_0001>
module attributes {stable_mosaic.version = 11 : i64} {
  func.func @actor_critic_eval_kernel(%arg0: i32, %arg1: memref<128x16xbf16, #tpu.memory_space<vmem>>, %arg2: memref<128x1xi32, #tpu.memory_space<vmem>>, %arg3: memref<16x32xbf16, #tpu.memory_space<vmem>>, %arg4: memref<1x32xf32, #tpu.memory_space<vmem>>, %arg5: memref<32x64xbf16, #tpu.memory_space<vmem>>, %arg6: memref<1x64xf32, #tpu.memory_space<vmem>>, %arg7: memref<64x9xbf16, #tpu.memory_space<vmem>>, %arg8: memref<1x9xf32, #tpu.memory_space<vmem>>, %arg9: memref<128x128xf32, #tpu.memory_space<vmem>>) attributes {dimension_semantics = [#tpu.dimension_semantics<parallel>], iteration_bounds = array<i64: 4>, scalar_prefetch = 0 : i64, scratch_operands = 0 : i64, tpu.core_type = #tpu.core_type<tc>, window_params = [{transform_indices = @transform_0, window_bounds = array<i64: 128, 16>}, {transform_indices = @transform_1, window_bounds = array<i64: 128, 1>}, {pipeline_mode = #tpu.pipeline_mode<synchronous>, transform_indices = @transform_2, window_bounds = array<i64: 16, 32>}, {pipeline_mode = #tpu.pipeline_mode<synchronous>, transform_indices = @transform_3, window_bounds = array<i64: 1, 32>}, {pipeline_mode = #tpu.pipeline_mode<synchronous>, transform_indices = @transform_4, window_bounds = array<i64: 32, 64>}, {pipeline_mode = #tpu.pipeline_mode<synchronous>, transform_indices = @transform_5, window_bounds = array<i64: 1, 64>}, {pipeline_mode = #tpu.pipeline_mode<synchronous>, transform_indices = @transform_6, window_bounds = array<i64: 64, 9>}, {pipeline_mode = #tpu.pipeline_mode<synchronous>, transform_indices = @transform_7, window_bounds = array<i64: 1, 9>}, {transform_indices = @transform_8, window_bounds = array<i64: 128, 128>}]} {
    %c0 = arith.constant 0 : index
    %c0_0 = arith.constant 0 : index
    %0 = vector.load %arg1[%c0, %c0_0] : memref<128x16xbf16, #tpu.memory_space<vmem>>, vector<128x16xbf16>
    %c0_1 = arith.constant 0 : index
    %c0_2 = arith.constant 0 : index
    %1 = vector.load %arg3[%c0_1, %c0_2] : memref<16x32xbf16, #tpu.memory_space<vmem>>, vector<16x32xbf16>
    %cst = arith.constant dense<0.000000e+00> : vector<128x32xf32>
    %2 = tpu.matmul %0, %1, %cst {dimension_numbers = #tpu.dot_dimension_numbers<[1], [0], [0], [1], [0, 0, 1, 1], [], []>} : vector<128x16xbf16>, vector<16x32xbf16>, vector<128x32xf32> -> vector<128x32xf32>
    %c0_3 = arith.constant 0 : index
    %c0_4 = arith.constant 0 : index
    %3 = vector.load %arg4[%c0_3, %c0_4] : memref<1x32xf32, #tpu.memory_space<vmem>>, vector<1x32xf32>
    %4 = vector.broadcast %3 : vector<1x32xf32> to vector<128x32xf32>
    %5 = arith.addf %2, %4 : vector<128x32xf32>
    %6 = math.tanh %5 : vector<128x32xf32>
    %7 = arith.truncf %6 : vector<128x32xf32> to vector<128x32xbf16>
    %c0_5 = arith.constant 0 : index
    %c0_6 = arith.constant 0 : index
    %8 = vector.load %arg5[%c0_5, %c0_6] : memref<32x64xbf16, #tpu.memory_space<vmem>>, vector<32x64xbf16>
    %cst_7 = arith.constant dense<0.000000e+00> : vector<128x64xf32>
    %9 = tpu.matmul %7, %8, %cst_7 {dimension_numbers = #tpu.dot_dimension_numbers<[1], [0], [0], [1], [0, 0, 1, 1], [], []>} : vector<128x32xbf16>, vector<32x64xbf16>, vector<128x64xf32> -> vector<128x64xf32>
    %c0_8 = arith.constant 0 : index
    %c0_9 = arith.constant 0 : index
    %10 = vector.load %arg6[%c0_8, %c0_9] : memref<1x64xf32, #tpu.memory_space<vmem>>, vector<1x64xf32>
    %11 = vector.broadcast %10 : vector<1x64xf32> to vector<128x64xf32>
    %12 = arith.addf %9, %11 : vector<128x64xf32>
    %13 = math.tanh %12 : vector<128x64xf32>
    %14 = arith.truncf %13 : vector<128x64xf32> to vector<128x64xbf16>
    %c0_10 = arith.constant 0 : index
    %c0_11 = arith.constant 0 : index
    %15 = vector.load %arg7[%c0_10, %c0_11] : memref<64x9xbf16, #tpu.memory_space<vmem>>, vector<64x9xbf16>
    %cst_12 = arith.constant dense<0.000000e+00> : vector<128x9xf32>
    %16 = tpu.matmul %14, %15, %cst_12 {dimension_numbers = #tpu.dot_dimension_numbers<[1], [0], [0], [1], [0, 0, 1, 1], [], []>} : vector<128x64xbf16>, vector<64x9xbf16>, vector<128x9xf32> -> vector<128x9xf32>
    %c0_13 = arith.constant 0 : index
    %c0_14 = arith.constant 0 : index
    %17 = vector.load %arg8[%c0_13, %c0_14] : memref<1x9xf32, #tpu.memory_space<vmem>>, vector<1x9xf32>
    %18 = vector.broadcast %17 : vector<1x9xf32> to vector<128x9xf32>
    %19 = arith.addf %16, %18 : vector<128x9xf32>
    %20 = vector.extract_strided_slice %19 {offsets = [0, 0], sizes = [128, 8], strides = [1, 1]} : vector<128x9xf32> to vector<128x8xf32>
    %21 = vector.extract_strided_slice %19 {offsets = [0, 8], sizes = [128, 1], strides = [1, 1]} : vector<128x9xf32> to vector<128x1xf32>
    %cst_15 = arith.constant dense<0xFF800000> : vector<128xf32>
    %22 = vector.multi_reduction <maximumf>, %20, %cst_15 [1] : vector<128x8xf32> to vector<128xf32>
    %23 = vector.shape_cast %22 : vector<128xf32> to vector<128x1xf32>
    %24 = vector.broadcast %23 : vector<128x1xf32> to vector<128x8xf32>
    %25 = arith.subf %20, %24 : vector<128x8xf32>
    %26 = math.exp %25 : vector<128x8xf32>
    %cst_16 = arith.constant dense<0.000000e+00> : vector<128xf32>
    %27 = vector.multi_reduction <add>, %26, %cst_16 [1] : vector<128x8xf32> to vector<128xf32>
    %28 = vector.shape_cast %27 : vector<128xf32> to vector<128x1xf32>
    %29 = math.log %28 : vector<128x1xf32>
    %30 = vector.broadcast %29 : vector<128x1xf32> to vector<128x8xf32>
    %31 = arith.subf %25, %30 : vector<128x8xf32>
    %c0_17 = arith.constant 0 : index
    %c0_18 = arith.constant 0 : index
    %32 = vector.load %arg2[%c0_17, %c0_18] : memref<128x1xi32, #tpu.memory_space<vmem>>, vector<128x1xi32>
    %33 = tpu.iota {dimensions = array<i32: 1>} : vector<128x8xi32>
    %34 = vector.broadcast %32 : vector<128x1xi32> to vector<128x8xi32>
    %35 = arith.cmpi eq, %33, %34 : vector<128x8xi32>
    %cst_19 = arith.constant 0.000000e+00 : f32
    %36 = vector.broadcast %cst_19 : f32 to vector<128x8xf32>
    %37 = arith.select %35, %31, %36 : vector<128x8xi1>, vector<128x8xf32>
    %cst_20 = arith.constant dense<0.000000e+00> : vector<128xf32>
    %38 = vector.multi_reduction <add>, %37, %cst_20 [1] : vector<128x8xf32> to vector<128xf32>
    %39 = vector.shape_cast %38 : vector<128xf32> to vector<128x1xf32>
    %40 = arith.mulf %26, %25 : vector<128x8xf32>
    %cst_21 = arith.constant dense<0.000000e+00> : vector<128xf32>
    %41 = vector.multi_reduction <add>, %40, %cst_21 [1] : vector<128x8xf32> to vector<128xf32>
    %42 = vector.shape_cast %41 : vector<128xf32> to vector<128x1xf32>
    %43 = tpu.reciprocal %28 {approx = true} : vector<128x1xf32> -> vector<128x1xf32>
    %44 = arith.mulf %42, %43 : vector<128x1xf32>
    %45 = arith.subf %29, %44 : vector<128x1xf32>
    %46 = tpu.iota {dimensions = array<i32: 1>} : vector<128x128xi32>
    %c0_i32 = arith.constant 0 : i32
    %47 = vector.broadcast %c0_i32 : i32 to vector<128x128xi32>
    %48 = arith.cmpi eq, %46, %47 : vector<128x128xi32>
    %cst_22 = arith.constant 0.000000e+00 : f32
    %49 = vector.shape_cast %21 : vector<128x1xf32> to vector<128x1xf32>
    %50 = vector.broadcast %49 : vector<128x1xf32> to vector<128x128xf32>
    %51 = vector.broadcast %cst_22 : f32 to vector<128x128xf32>
    %52 = arith.select %48, %50, %51 : vector<128x128xi1>, vector<128x128xf32>
    %c1_i32 = arith.constant 1 : i32
    %53 = vector.broadcast %c1_i32 : i32 to vector<128x128xi32>
    %54 = arith.cmpi eq, %46, %53 : vector<128x128xi32>
    %55 = vector.shape_cast %39 : vector<128x1xf32> to vector<128x1xf32>
    %56 = vector.broadcast %55 : vector<128x1xf32> to vector<128x128xf32>
    %57 = arith.select %54, %56, %52 : vector<128x128xi1>, vector<128x128xf32>
    %c2_i32 = arith.constant 2 : i32
    %58 = vector.broadcast %c2_i32 : i32 to vector<128x128xi32>
    %59 = arith.cmpi eq, %46, %58 : vector<128x128xi32>
    %60 = vector.shape_cast %45 : vector<128x1xf32> to vector<128x1xf32>
    %61 = vector.broadcast %60 : vector<128x1xf32> to vector<128x128xf32>
    %62 = arith.select %59, %61, %57 : vector<128x128xi1>, vector<128x128xf32>
    %c0_23 = arith.constant 0 : index
    %c0_24 = arith.constant 0 : index
    %63 = vector.load %arg9[%c0_23, %c0_24] : memref<128x128xf32, #tpu.memory_space<vmem>>, vector<128x128xf32>
    tpu.vector_store %arg9[%c0_23, %c0_24], %62 {strides = array<i32>} : memref<128x128xf32, #tpu.memory_space<vmem>>, vector<128x128xf32>,
    return
  }
  func.func @transform_0(%arg0: i32) -> (i32, i32) {
    %c0_i32 = arith.constant 0 : i32
    %c0_i32_0 = arith.constant 0 : i32
    return %arg0, %c0_i32 : i32, i32
  }
  func.func @transform_1(%arg0: i32) -> (i32, i32) {
    %c0_i32 = arith.constant 0 : i32
    %c0_i32_0 = arith.constant 0 : i32
    return %arg0, %c0_i32 : i32, i32
  }
  func.func @transform_2(%arg0: i32) -> (i32, i32) {
    %c0_i32 = arith.constant 0 : i32
    %c0_i32_0 = arith.constant 0 : i32
    %c0_i32_1 = arith.constant 0 : i32
    return %c0_i32, %c0_i32_0 : i32, i32
  }
  func.func @transform_3(%arg0: i32) -> (i32, i32) {
    %c0_i32 = arith.constant 0 : i32
    %c0_i32_0 = arith.constant 0 : i32
    %c0_i32_1 = arith.constant 0 : i32
    return %c0_i32, %c0_i32_0 : i32, i32
  }
  func.func @transform_4(%arg0: i32) -> (i32, i32) {
    %c0_i32 = arith.constant 0 : i32
    %c0_i32_0 = arith.constant 0 : i32
    %c0_i32_1 = arith.constant 0 : i32
    return %c0_i32, %c0_i32_0 : i32, i32
  }
  func.func @transform_5(%arg0: i32) -> (i32, i32) {
    %c0_i32 = arith.constant 0 : i32
    %c0_i32_0 = arith.constant 0 : i32
    %c0_i32_1 = arith.constant 0 : i32
    return %c0_i32, %c0_i32_0 : i32, i32
  }
  func.func @transform_6(%arg0: i32) -> (i32, i32) {
    %c0_i32 = arith.constant 0 : i32
    %c0_i32_0 = arith.constant 0 : i32
    %c0_i32_1 = arith.constant 0 : i32
    return %c0_i32, %c0_i32_0 : i32, i32
  }
  func.func @transform_7(%arg0: i32) -> (i32, i32) {
    %c0_i32 = arith.constant 0 : i32
    %c0_i32_0 = arith.constant 0 : i32
    %c0_i32_1 = arith.constant 0 : i32
    return %c0_i32, %c0_i32_0 : i32, i32
  }
  func.func @transform_8(%arg0: i32) -> (i32, i32) {
    %c0_i32 = arith.constant 0 : i32
    %c0_i32_0 = arith.constant 0 : i32
    return %arg0, %c0_i32 : i32, i32
  }
}

</mosaic_0001>

<bundles_post_ra>
// kernel: actor_critic_evaluate.1
= control target key start
LH: loop header
LB: loop body
LE: loop exit
PB: predicated region body
PF: predicated region fallthrough
CT: control target
= control target key end

     0   :  { %s1939_s27 = smov 0   ;;  %s2690_s0 = inlined_call_operand.vmem [shape: bf16[512,16], index: 0, kind: input, shape index: {}]   ;;  %s2691_s1 = inlined_call_operand.vmem [shape: s32[512,1], index: 1, kind: input, shape index: {}]   ;;  %s2692_s2 = inlined_call_operand.vmem [shape: bf16[16,32], index: 2, kind: input, shape index: {}]   ;;  %s2693_s3 = inlined_call_operand.vmem [shape: f32[1,32], index: 3, kind: input, shape index: {}]   ;;  %s2694_s4 = inlined_call_operand.vmem [shape: bf16[32,64], index: 4, kind: input, shape index: {}]   ;;  %s2695_s5 = inlined_call_operand.vmem [shape: f32[1,64], index: 5, kind: input, shape index: {}]   ;;  %s2696_s6 = inlined_call_operand.vmem [shape: bf16[64,9], index: 6, kind: input, shape index: {}]   ;;  %s2697_s7 = inlined_call_operand.vmem [shape: f32[1,9], index: 7, kind: input, shape index: {}]   ;;  %s2698_s8 = inlined_call_operand.vmem [shape: f32[512,128], index: 8, kind: output, shape index: {}]  }
   0x1 LB: > { %s1545_s28 = sadd.s32 4294967295, %s1890_s27   ;;  %p1549_p0 = scmp.ge.s32.totalorder %s1890_s27, 1  ;;  %s1890_s27 = sphi %s1939_s27, %s18_s27  }
   0x2   : > { %p274_p1 = scmp.lt.s32.totalorder %s1890_s27, 5 }
   0x4   : > { %p275_p2 = pnand %p1549_p0, %p274_p1 }
   0x6   : > { %278 = sbr.rel (%p275_p2) target bundleno = 1444 (0x5a4), region = 52 }
   0xd   : > { %v1709_v0 = vld [vmem:[%s2692_s2] sm:$0xff]   ;;  %s1550_s9 = sshll.u32 %s1545_s28, 4  ;;  %vm403_vm0 = vcmask 130048   ;;  %v1719_v10 = vld [vmem:[%s2694_s4 + $0x8] sm:$0xff]   ;;  %vm572_vm1 = vcmask 261120   ;;  %vm757_vm2 = vcmask 523264  }
   0xe   : > { %p314_p3 = scmp.lt.s32.totalorder %s1550_s9, 63  ;;  %1631 = vmatprep.subr.bf16.mxu0 %v1709_v0  ;;  %1693 = vmatprep.subr.bf16.mxu1 %v1709_v0  ;;  %v1718_v9 = vld [vmem:[%s2694_s4] sm:$0xff]   ;;  %vm879_vm3 = vcmask 64512  }
   0xf   : > { %1632 = vmatpush3.bf16.msra.mxu0 %v1709_v0  ;;  %1694 = vmatpush3.bf16.msra.mxu1 %v1709_v0  ;;  %v1556_v11 = vld [vmem:[%s2693_s3] ss:$0 sm:$0xff] }
  0x10   : > { %s2738_s9 = smov (!%p314_p3, %s1550_s9), 63  ;;  %1649 = vmatprep.subr.bf16.mxu1 %v1718_v9 }
  0x11   : > { %s1551_s10 = sshll.u32 %s2738_s9, 2  ;;  %s1553_s29 = sshll.u32 %s2738_s9, 3 }
  0x12   : > { %s317_s13 = scalar_lea.vmem %s2690_s0, %s1551_s10  ;;  %s1999_s11 = scalar_lea.vmem %s2691_s1, %s1553_s29 }
  0x13   : > { %v1710_v1 = vld [vmem:[%s317_s13] sm:$0xff]   ;;  %v1711_v2 = vld [vmem:[%s317_s13 + $0x8] sm:$0xff]   ;;  %v1712_v3 = vld [vmem:[%s317_s13 + $0x10] sm:$0xff]   ;;  %s2421_s18 = scalar_lea.vmem %s2698_s8, %s1553_s29 }
  0x14   : > { %1633 = vmatprep.mubr.msk.bf16.mxu0 %vm403_vm0, %v1710_v1  ;;  %v1714_v4 = vld [vmem:[%s317_s13 + $0x20] sm:$0xff]   ;;  %v1715_v5 = vld [vmem:[%s317_s13 + $0x28] sm:$0xff]   ;;  %v1716_v6 = vld [vmem:[%s317_s13 + $0x30] sm:$0xff]  }
  0x15   : > { %1634 = vmatmul.mubr.msk.bf16.vlgmr.msra.gmra.mrb[0].mxu0 %vm403_vm0, %v1711_v2  ;;  %1641 = vmatprep.mubr.msk.bf16.mxu1 %vm403_vm0, %v1714_v4  ;;  %v1713_v7 = vld [vmem:[%s317_s13 + $0x18] sm:$0xff]   ;;  %v1720_v4 = vld [vmem:[%s2696_s6] sm:$0xff]  }
  0x16   : > { %1637 = vmatprep.mubr.msk.bf16.mxu0 %vm403_vm0, %v1712_v3  ;;  %1642 = vmatmul.mubr.msk.bf16.vlgmr.msra.gmra.mrb[0].mxu1 %vm403_vm0, %v1715_v5  ;;  %v1717_v8 = vld [vmem:[%s317_s13 + $0x38] sm:$0xff]   ;;  %v1721_v5 = vld [vmem:[%s2696_s6 + $0x8] sm:$0xff]  }
  0x17   : > { %1645 = vmatprep.mubr.msk.bf16.mxu1 %vm403_vm0, %v1716_v6  ;;  %1650 = vmatpush3.bf16.msra.mxu1 %v1718_v9  ;;  %v1722_v6 = vld [vmem:[%s2696_s6 + $0x10] sm:$0xff]   ;;  %v1073_v9 = vld [vmem:[%s1999_s11 + $0x8] sm:$0xff] }
  0x18   : > { %1651 = vmatprep.subr.bf16.mxu1 %v1719_v10  ;;  %1669 = vmatprep.subr.bf16.mxu0 %v1720_v4 }
  0x19   : > { %1670 = vmatpush3.bf16.msra.mxu0 %v1720_v4 }
  0x1a   : > { %1671 = vmatprep.subr.bf16.mxu0 %v1721_v5 }
  0x1b   : > { %1652 = vmatpush3.bf16.msra.mxu1 %v1719_v10  ;;  %v1074_v10 = vld [vmem:[%s1999_s11 + $0x10] sm:$0xff] }
  0x1d   : > { %1638 = vmatmul.mubr.msk.bf16.gmra.mrb[4].mxu0 %vm403_vm0, %v1713_v7  ;;  %v1723_v7 = vld [vmem:[%s2696_s6 + $0x18] sm:$0xff]  }
  0x1e   : > { %1646 = vmatmul.mubr.msk.bf16.gmra.mrb[4].mxu1 %vm403_vm0, %v1717_v8  ;;  %1672 = vmatpush3.bf16.msra.mxu0 %v1721_v5  ;;  %v1892_v8 = vmov 0  }
  0x1f   : > { %1673 = vmatprep.subr.bf16.mxu0 %v1722_v6  ;;  %1706 = vset.pattern.permute.xlu1 %v1892_v8 }
  0x20   : > { %1705 = vset.pattern.permute.xlu0 %v1892_v8  ;;  %1094 = vperm.xlu1 %1706, %v1073_v9  }
  0x22   : > { %1674 = vmatpush3.bf16.msra.mxu0 %v1722_v6 }
  0x23   : > { %1675 = vmatprep.subr.bf16.mxu0 %v1723_v7 }
  0x24   : > { %1097 = vperm.xlu1 %1706, %v1074_v10  }
  0x26   : > { %1676 = vmatpush3.bf16.msra.mxu0 %v1723_v7 }
  0xe8   : > { %v1635_v12 = vpop.f32.mrb[0].mxu0 }
  0xe9   : > { %v471_v13 = vadd.f32 %v1635_v12, %v1556_v11  ;;  %v462_v14 = vpop.f32.mrb[1].mxu0  ;;  %v1643_v20 = vpop.f32.mrb[0].mxu1  ;;  %v1081_v12 = vld [vmem:[%s1999_s11 + $0x48] sm:$0xff] }
  0xea   : > { %v463_v15 = vadd.f32 %v1556_v11, %v462_v14  ;;  %v1636_v16 = vpop.f32.mrb[2].mxu0  ;;  %v503_v21 = vadd.f32 %v1643_v20, %v1556_v11  ;;  %v494_v22 = vpop.f32.mrb[1].mxu1  ;;  %v1083_v14 = vld [vmem:[%s1999_s11 + $0x58] sm:$0xff] }
  0xeb   : > { %1724 = vtanh.f32 %v471_v13  ;;  %v474_v17 = vadd.f32 %v1636_v16, %v1556_v11  ;;  %v465_v18 = vpop.f32.mrb[3].mxu0  ;;  %v495_v23 = vadd.f32 %v1556_v11, %v494_v22  ;;  %v1644_v24 = vpop.f32.mrb[2].mxu1  ;;  %v1075_v13 = vld [vmem:[%s1999_s11 + $0x18] sm:$0xff]  ;;  %v1085_v16 = vld [vmem:[%s1999_s11 + $0x68] sm:$0xff]  ;;  %v1082_v22 = vld [vmem:[%s1999_s11 + $0x50] sm:$0xff] }
  0xec   : > { %1726 = vtanh.f32 %v463_v15  ;;  %v466_v19 = vadd.f32 %v1556_v11, %v465_v18  ;;  %v506_v25 = vadd.f32 %v1644_v24, %v1556_v11  ;;  %v497_v26 = vpop.f32.mrb[3].mxu1  ;;  %1100 = vperm.xlu1 %1706, %v1075_v13   ;;  %v1076_v15 = vld [vmem:[%s1999_s11 + $0x20] sm:$0xff]  ;;  %v1087_v18 = vld [vmem:[%s1999_s11 + $0x78] sm:$0xff]  ;;  %v1086_v24 = vld [vmem:[%s1999_s11 + $0x70] sm:$0xff] }
  0xed   : > { %1728 = vtanh.f32 %v474_v17  ;;  %v498_v28 = vadd.f32 %v1556_v11, %v497_v26  ;;  %v1077_v17 = vld [vmem:[%s1999_s11 + $0x28] sm:$0xff]  ;;  %v1079_v20 = vld [vmem:[%s1999_s11 + $0x38] sm:$0xff] }
  0xee   : > { %1730 = vtanh.f32 %v466_v19  ;;  %v1078_v19 = vld [vmem:[%s1999_s11 + $0x30] sm:$0xff] }
  0xef   : > { %1732 = vtanh.f32 %v503_v21  ;;  %v1080_v21 = vld [vmem:[%s1999_s11 + $0x40] sm:$0xff] }
  0xf0   : > { %v1639_v27 = vpop.f32.mrb[4].mxu0  ;;  %1734 = vtanh.f32 %v495_v23  ;;  %1103 = vperm.xlu1 %1706, %v1076_v15   ;;  %v1084_v23 = vld [vmem:[%s1999_s11 + $0x60] sm:$0xff] }
  0xf1   : > { %v487_v29 = vadd.f32 %v1639_v27, %v1556_v11  ;;  %v478_v30 = vpop.f32.mrb[5].mxu0  ;;  %1736 = vtanh.f32 %v506_v25  ;;  %v1647_v36 = vpop.f32.mrb[4].mxu1  ;;  %v2020_v25 = vld [vmem:[%s2695_s5] ss:$0 sm:$0xff] }
  0xf2   : > { %v479_v31 = vadd.f32 %v1556_v11, %v478_v30  ;;  %v1640_v32 = vpop.f32.mrb[6].mxu0  ;;  %1738 = vtanh.f32 %v498_v28  ;;  %v519_v38 = vadd.f32 %v1647_v36, %v1556_v11  ;;  %v510_v39 = vpop.f32.mrb[5].mxu1 }
  0xf3   : > { %1740 = vtanh.f32 %v487_v29  ;;  %v490_v33 = vadd.f32 %v1640_v32, %v1556_v11  ;;  %v481_v34 = vpop.f32.mrb[7].mxu0  ;;  %v511_v41 = vadd.f32 %v1556_v11, %v510_v39  ;;  %v1648_v42 = vpop.f32.mrb[6].mxu1 }
  0xf4   : > { %1742 = vtanh.f32 %v479_v31  ;;  %v482_v35 = vadd.f32 %v1556_v11, %v481_v34  ;;  %v522_v44 = vadd.f32 %v1648_v42, %v1556_v11  ;;  %v513_v45 = vpop.f32.mrb[7].mxu1  ;;  %1106 = vperm.xlu1 %1706, %v1077_v17  }
  0xf5   : > { %v1725_v37 = vpop.eup %1724  ;;  %1744 = vtanh.f32 %v490_v33  ;;  %v514_v48 = vadd.f32 %v1556_v11, %v513_v45  ;;  %v1072_v11 = vld [vmem:[%s1999_s11] sm:$0xff] }
  0xf6   : > { %v1727_v40 = vpop.eup %1726  ;;  %1746 = vtanh.f32 %v482_v35  ;;  %1091 = vperm.xlu0 %1705, %v1072_v11  }
  0xf7   : > { %v1729_v43 = vpop.eup %1728  ;;  %1748 = vtanh.f32 %v519_v38 }
  0xf8   : > { %v1731_v46 = vpop.eup %1730  ;;  %v542_v47 = vpack.c.bf16 %v1729_v43, %v1725_v37  ;;  %1750 = vtanh.f32 %v511_v41  ;;  %1109 = vperm.xlu1 %1706, %v1078_v19   ;;  %v2049_v19 = vld [vmem:[%s2697_s7] ss:$0 sm:$0xff] }
  0xf9   : > { %v1733_v49 = vpop.eup %1732  ;;  %v541_v50 = vpack.c.bf16 %v1731_v46, %v1727_v40  ;;  %1752 = vtanh.f32 %v522_v44 }
  0xfa   : > { %v1735_v51 = vpop.eup %1734  ;;  %1754 = vtanh.f32 %v514_v48  ;;  %1118 = vperm.xlu0 %1705, %v1081_v12  }
  0xfb   : > { %v1737_v52 = vpop.eup %1736  ;;  %1653 = vmatprep.mubr.msk.bf16.mxu1 %vm572_vm1, %v541_v50 }
  0xfc   : > { %v1739_v53 = vpop.eup %1738  ;;  %1654 = vmatmul.mubr.msk.bf16.vlgmr.msra.gmra.mrb[8].mxu1 %vm572_vm1, %v542_v47  ;;  %v546_v54 = vpack.c.bf16 %v1737_v52, %v1733_v49  ;;  %1112 = vperm.xlu1 %1706, %v1079_v20  }
  0xfd   : > { %v1741_v55 = vpop.eup %1740  ;;  %v545_v56 = vpack.c.bf16 %v1739_v53, %v1735_v51 }
  0xfe   : > { %v1743_v57 = vpop.eup %1742  ;;  %1124 = vperm.xlu0 %1705, %v1083_v14  }
  0xff   : > { %v1745_v58 = vpop.eup %1744 }
 0x100   : > { %v1747_v59 = vpop.eup %1746  ;;  %v544_v60 = vpack.c.bf16 %v1745_v58, %v1741_v55  ;;  %1115 = vperm.xlu1 %1706, %v1080_v21  }
 0x101   : > { %v1749_v61 = vpop.eup %1748  ;;  %v543_v62 = vpack.c.bf16 %v1747_v59, %v1743_v57 }
 0x102   : > { %v1751_v63 = vpop.eup %1750  ;;  %1130 = vperm.xlu0 %1705, %v1085_v16  }
 0x103   : > { %v1753_v0 = vpop.eup %1752  ;;  %1657 = vmatprep.mubr.msk.bf16.mxu1 %vm572_vm1, %v543_v62 }
 0x104   : > { %v1755_v1 = vpop.eup %1754  ;;  %1658 = vmatmul.mubr.msk.bf16.gmra.mrb[12].mxu1 %vm572_vm1, %v544_v60  ;;  %v548_v2 = vpack.c.bf16 %v1753_v0, %v1749_v61  ;;  %1121 = vperm.xlu1 %1706, %v1082_v22  }
 0x105   : > { %1661 = vmatprep.mubr.msk.bf16.mxu1 %vm572_vm1, %v545_v56  ;;  %v547_v3 = vpack.c.bf16 %v1755_v1, %v1751_v63 }
 0x106   : > { %1136 = vperm.xlu0 %1705, %v1087_v18   ;;  %v1893_v18 = vmov 8  }
 0x108   : > { %1127 = vperm.xlu1 %1706, %v1084_v23  }
 0x10a   : > { %1708 = vset.pattern.permute.xlu0 %v1893_v18 }
 0x10c   : > { %1662 = vmatmul.mubr.msk.bf16.gmra.mrb[16].mxu1 %vm572_vm1, %v546_v54  ;;  %1133 = vperm.xlu1 %1706, %v1086_v24  }
 0x10d   : > { %1665 = vmatprep.mubr.msk.bf16.mxu1 %vm572_vm1, %v547_v3 }
 0x110   : > { %1707 = vset.pattern.permute.xlu1 %v1893_v18 }
 0x114   : > { %1666 = vmatmul.mubr.msk.bf16.gmra.mrb[20].mxu1 %vm572_vm1, %v548_v2 }
 0x1cf   : > { %v1655_v26 = vpop.f32.mrb[8].mxu1 }
 0x1d0   : > { %v640_v27 = vadd.f32 %v1655_v26, %v2020_v25  ;;  %v631_v28 = vpop.f32.mrb[9].mxu1 }
 0x1d1   : > { %v632_v29 = vadd.f32 %v2020_v25, %v631_v28  ;;  %v1656_v30 = vpop.f32.mrb[10].mxu1 }
 0x1d2   : > { %1756 = vtanh.f32 %v640_v27  ;;  %v643_v31 = vadd.f32 %v1656_v30, %v2020_v25  ;;  %v634_v32 = vpop.f32.mrb[11].mxu1 }
 0x1d3   : > { %1758 = vtanh.f32 %v632_v29  ;;  %v635_v33 = vadd.f32 %v2020_v25, %v634_v32 }
 0x1d4   : > { %1760 = vtanh.f32 %v643_v31 }
 0x1d5   : > { %1762 = vtanh.f32 %v635_v33 }
 0x1d7   : > { %v1659_v34 = vpop.f32.mrb[12].mxu1 }
 0x1d8   : > { %v656_v35 = vadd.f32 %v1659_v34, %v2020_v25  ;;  %v647_v36 = vpop.f32.mrb[13].mxu1 }
 0x1d9   : > { %v648_v37 = vadd.f32 %v2020_v25, %v647_v36  ;;  %v1660_v38 = vpop.f32.mrb[14].mxu1 }
 0x1da   : > { %1764 = vtanh.f32 %v656_v35  ;;  %v659_v39 = vadd.f32 %v1660_v38, %v2020_v25  ;;  %v650_v40 = vpop.f32.mrb[15].mxu1 }
 0x1db   : > { %1766 = vtanh.f32 %v648_v37  ;;  %v651_v41 = vadd.f32 %v2020_v25, %v650_v40 }
 0x1dc   : > { %v1757_v42 = vpop.eup %1756  ;;  %1768 = vtanh.f32 %v659_v39 }
 0x1dd   : > { %v1759_v43 = vpop.eup %1758  ;;  %1770 = vtanh.f32 %v651_v41 }
 0x1de   : > { %v1761_v44 = vpop.eup %1760 }
 0x1df   : > { %v1763_v45 = vpop.eup %1762  ;;  %v711_v46 = vpack.c.bf16 %v1761_v44, %v1757_v42  ;;  %v1663_v47 = vpop.f32.mrb[16].mxu1 }
 0x1e0   : > { %v710_v48 = vpack.c.bf16 %v1763_v45, %v1759_v43  ;;  %v672_v49 = vadd.f32 %v1663_v47, %v2020_v25  ;;  %v663_v50 = vpop.f32.mrb[17].mxu1 }
 0x1e1   : > { %v664_v51 = vadd.f32 %v2020_v25, %v663_v50  ;;  %v1664_v52 = vpop.f32.mrb[18].mxu1 }
 0x1e2   : > { %1677 = vmatprep.mubr.msk.bf16.mxu0 %vm757_vm2, %v710_v48  ;;  %1772 = vtanh.f32 %v672_v49  ;;  %v675_v53 = vadd.f32 %v1664_v52, %v2020_v25  ;;  %v666_v54 = vpop.f32.mrb[19].mxu1 }
 0x1e3   : > { %1678 = vmatmul.mubr.msk.bf16.vlgmr.msra.gmra.mrb[8].mxu0 %vm757_vm2, %v711_v46  ;;  %1774 = vtanh.f32 %v664_v51  ;;  %v667_v55 = vadd.f32 %v2020_v25, %v666_v54 }
 0x1e4   : > { %v1765_v56 = vpop.eup %1764  ;;  %1776 = vtanh.f32 %v675_v53 }
 0x1e5   : > { %v1767_v57 = vpop.eup %1766  ;;  %1778 = vtanh.f32 %v667_v55 }
 0x1e6   : > { %v1769_v58 = vpop.eup %1768 }
 0x1e7   : > { %v1771_v59 = vpop.eup %1770  ;;  %v713_v60 = vpack.c.bf16 %v1769_v58, %v1765_v56  ;;  %v1667_v61 = vpop.f32.mrb[20].mxu1 }
 0x1e8   : > { %v712_v62 = vpack.c.bf16 %v1771_v59, %v1767_v57  ;;  %v688_v63 = vadd.f32 %v1667_v61, %v2020_v25  ;;  %v679_v0 = vpop.f32.mrb[21].mxu1  ;;  %v2115_v57 = vpop.permute.xlu1 %1094 }
 0x1e9   : > { %v680_v1 = vadd.f32 %v2020_v25, %v679_v0  ;;  %v1668_v2 = vpop.f32.mrb[22].mxu1 }
 0x1ea   : > { %1681 = vmatprep.mubr.msk.bf16.mxu0 %vm757_vm2, %v712_v62  ;;  %1780 = vtanh.f32 %v688_v63  ;;  %v691_v3 = vadd.f32 %v1668_v2, %v2020_v25  ;;  %v682_v4 = vpop.f32.mrb[23].mxu1 }
 0x1eb   : > { %1682 = vmatmul.mubr.msk.bf16.gmra.mrb[12].mxu0 %vm757_vm2, %v713_v60  ;;  %1782 = vtanh.f32 %v680_v1  ;;  %v683_v5 = vadd.f32 %v2020_v25, %v682_v4  ;;  %v2137_v1 = vpop.permute.xlu0 %1091 }
 0x1ec   : > { %v1773_v6 = vpop.eup %1772  ;;  %1784 = vtanh.f32 %v691_v3  ;;  %v2119_v58 = vpop.permute.xlu1 %1097 }
 0x1ed   : > { %v1775_v7 = vpop.eup %1774  ;;  %1786 = vtanh.f32 %v683_v5 }
 0x1ee   : > { %v1777_v8 = vpop.eup %1776 }
 0x1ef   : > { %v1779_v9 = vpop.eup %1778  ;;  %v715_v10 = vpack.c.bf16 %v1777_v8, %v1773_v6  ;;  %v2141_v3 = vpop.permute.xlu0 %1118 }
 0x1f0   : > { %v714_v11 = vpack.c.bf16 %v1779_v9, %v1775_v7  ;;  %v2125_v60 = vpop.permute.xlu1 %1100 }
 0x1f2   : > { %1685 = vmatprep.mubr.msk.bf16.mxu0 %vm757_vm2, %v714_v11 }
 0x1f3   : > { %1686 = vmatmul.mubr.msk.bf16.gmra.mrb[16].mxu0 %vm757_vm2, %v715_v10  ;;  %v2145_v5 = vpop.permute.xlu0 %1124 }
 0x1f4   : > { %v1781_v12 = vpop.eup %1780  ;;  %v2127_v61 = vpop.permute.xlu1 %1103 }
 0x1f5   : > { %v1783_v13 = vpop.eup %1782 }
 0x1f6   : > { %v1785_v14 = vpop.eup %1784 }
 0x1f7   : > { %v1787_v15 = vpop.eup %1786  ;;  %v717_v16 = vpack.c.bf16 %v1785_v14, %v1781_v12  ;;  %v2151_v8 = vpop.permute.xlu0 %1130 }
 0x1f8   : > { %v716_v17 = vpack.c.bf16 %v1787_v15, %v1783_v13  ;;  %v2133_v63 = vpop.permute.xlu1 %1106 }
 0x1fa   : > { %1689 = vmatprep.mubr.msk.bf16.mxu0 %vm757_vm2, %v716_v17 }
 0x1fb   : > { %1690 = vmatmul.mubr.msk.bf16.gmra.mrb[20].mxu0 %vm757_vm2, %v717_v16  ;;  %v2155_v10 = vpop.permute.xlu0 %1136 }
 0x1fc   : > { %v2135_v0 = vpop.permute.xlu1 %1109 }
 0x200   : > { %v2139_v2 = vpop.permute.xlu1 %1112 }
 0x204   : > { %v2143_v4 = vpop.permute.xlu1 %1115 }
 0x208   : > { %v2149_v7 = vpop.permute.xlu1 %1121 }
 0x20c   : > { %v2153_v9 = vpop.permute.xlu1 %1127 }
 0x210   : > { %v2161_v12 = vpop.permute.xlu1 %1133 }
 0x2b6   : > { %v1679_v20 = vpop.f32.mrb[8].mxu0 }
 0x2b7   : > { %v2052_v21 = vadd.f32 %v1679_v20, %v2049_v19  ;;  %v816_v22 = vpop.f32.mrb[9].mxu0 }
 0x2b8   : > { %v2055_v23 = vadd.f32 %v2049_v19, %v816_v22  ;;  %v1680_v24 = vpop.f32.mrb[10].mxu0 }
 0x2b9   : > { %1343 = vperm.xlu1 %1707, %v2052_v21   ;;  %v819_v25 = vpop.f32.mrb[11].mxu0  ;;  %v886_v39 = vsel %vm879_vm3, %v2052_v21, -inf  ;;  %v2091_v48 = vadd.f32 %v1680_v24, %v2049_v19 }
 0x2ba   : > { %1333 = vperm.xlu0 %1708, %v2055_v23   ;;  %v2062_v36 = vadd.f32 %v2049_v19, %v819_v25  ;;  %v880_v37 = vsel %vm879_vm3, %v2055_v23, -inf }
 0x2bb   : > { %v889_v52 = vsel %vm879_vm3, %v2091_v48, -inf }
 0x2bc   : > { %v883_v40 = vsel %vm879_vm3, %v2062_v36, -inf }
 0x2be   : > { %v1683_v26 = vpop.f32.mrb[12].mxu0 }
 0x2bf   : > { %v832_v27 = vpop.f32.mrb[13].mxu0  ;;  %v2067_v38 = vadd.f32 %v1683_v26, %v2049_v19 }
 0x2c0   : > { %v1684_v28 = vpop.f32.mrb[14].mxu0  ;;  %v2074_v41 = vadd.f32 %v2049_v19, %v832_v27 }
 0x2c1   : > { %v2059_v29 = vpop.f32.mrb[15].mxu0  ;;  %v898_v42 = vsel %vm879_vm3, %v2067_v38, -inf  ;;  %v2122_v59 = vadd.f32 %v1684_v28, %v2049_v19 }
 0x2c2   : > { %v892_v44 = vsel %vm879_vm3, %v2074_v41, -inf  ;;  %v2159_v11 = vadd.f32 %v2049_v19, %v2059_v29 }
 0x2c3   : > { %v901_v6 = vsel %vm879_vm3, %v2122_v59, -inf }
 0x2c6   : > { %v1687_v30 = vpop.f32.mrb[16].mxu0 }
 0x2c7   : > { %v848_v31 = vpop.f32.mrb[17].mxu0  ;;  %v2079_v43 = vadd.f32 %v1687_v30, %v2049_v19 }
 0x2c8   : > { %v1688_v32 = vpop.f32.mrb[18].mxu0  ;;  %v2084_v45 = vadd.f32 %v2049_v19, %v848_v31 }
 0x2c9   : > { %v851_v33 = vpop.f32.mrb[19].mxu0  ;;  %v910_v46 = vsel %vm879_vm3, %v2079_v43, -inf  ;;  %v2130_v62 = vadd.f32 %v1688_v32, %v2049_v19 }
 0x2ca   : > { %v904_v47 = vsel %vm879_vm3, %v2084_v45, -inf  ;;  %v2095_v49 = vadd.f32 %v2049_v19, %v851_v33 }
 0x2ce   : > { %v1691_v34 = vpop.f32.mrb[20].mxu0 }
 0x2cf   : > { %v864_v35 = vpop.f32.mrb[21].mxu0  ;;  %v2105_v53 = vadd.f32 %v1691_v34, %v2049_v19 }
 0x2d0   : > { %v2098_v50 = vpop.f32.mrb[22].mxu0  ;;  %v2108_v54 = vadd.f32 %v2049_v19, %v864_v35 }
 0x2d1   : > { %v2100_v51 = vpop.f32.mrb[23].mxu0  ;;  %v922_v55 = vsel %vm879_vm3, %v2105_v53, -inf }
 0x2d2   : > { %v916_v56 = vsel %vm879_vm3, %v2108_v54, -inf }
 0x2d9   : > { %881 = vmax.xlane.f32.xlu0 %v880_v37 }
 0x2dd   : > { %887 = vmax.xlane.f32.xlu1 %v886_v39  ;;  %884 = vmax.xlane.f32.xlu0 %v883_v40 }
 0x2e1   : > { %899 = vmax.xlane.f32.xlu0 %v898_v42 }
 0x2e5   : > { %893 = vmax.xlane.f32.xlu0 %v892_v44 }
 0x2e9   : > { %911 = vmax.xlane.f32.xlu0 %v910_v46 }
 0x2ed   : > { %905 = vmax.xlane.f32.xlu0 %v904_v47 }
 0x2ee   : > { %1348 = vperm.xlu1 %1707, %v2091_v48  }
 0x303   : > { %1378 = vperm.xlu0 %1708, %v2095_v49  }
 0x312   : > { %890 = vmax.xlane.f32.xlu1 %v889_v52 }
 0x322   : > { %923 = vmax.xlane.f32.xlu0 %v922_v55 }
 0x323   : > { %1338 = vperm.xlu1 %1707, %v2062_v36  }
 0x326   : > { %917 = vmax.xlane.f32.xlu0 %v916_v56 }
 0x327   : > { %1363 = vperm.xlu1 %1707, %v2067_v38  }
 0x32b   : > { %1353 = vperm.xlu1 %1707, %v2074_v41  }
 0x32f   : > { %1368 = vperm.xlu1 %1707, %v2122_v59  }
 0x338   : > { %v2166_v14 = vpop.permute.xlu1 %1343 }
 0x339   : > { %v2163_v13 = vpop.permute.xlu0 %1333 }
 0x33a   : > { %2703 = vst [vmem:[#allocation2_spill] sm:$0xff] %v2163_v13 }
 0x33c   : > { %1388 = vperm.xlu0 %1708, %v2130_v62  }
 0x353   : > { %902 = vmax.xlane.f32.xlu1 %v901_v6 }
 0x364   : > { %1358 = vperm.xlu1 %1707, %v2159_v11  }
 0x366   : > { %v882_v15 = vpop.xlane.xlu0 %881 }
 0x367   : > { %v2169_v16 = vsub.f32 %v2055_v23, %v882_v15 }
 0x369   : > { %v944_v22 = vmul.f32 1.442695, %v2169_v16 }
 0x36a   : > { %v888_v17 = vpop.xlane.xlu1 %887  ;;  %v2171_v18 = vpop.xlane.xlu0 %884 }
 0x36b   : > { %v2174_v20 = vsub.f32 %v2052_v21, %v888_v17 }
 0x36d   : > { %v948_v24 = vmul.f32 1.442695, %v2174_v20 }
 0x36e   : > { %v900_v25 = vpop.xlane.xlu0 %899 }
 0x36f   : > { %1788 = vpow2.f32 %v948_v24  ;;  %v2179_v26 = vsub.f32 %v2067_v38, %v900_v25 }
 0x370   : > { %1790 = vpow2.f32 %v944_v22 }
 0x371   : > { %v956_v23 = vmul.f32 1.442695, %v2179_v26 }
 0x372   : > { %v894_v27 = vpop.xlane.xlu0 %893 }
 0x373   : > { %v2183_v29 = vsub.f32 %v2074_v41, %v894_v27  ;;  %1792 = vpow2.f32 %v956_v23  ;;  %v895_v41 = vsel %vm879_vm3, %v2159_v11, -inf }
 0x375   : > { %v952_v31 = vmul.f32 1.442695, %v2183_v29 }
 0x376   : > { %v912_v34 = vpop.xlane.xlu0 %911 }
 0x377   : > { %1794 = vpow2.f32 %v952_v31  ;;  %v2193_v40 = vsub.f32 %v2079_v43, %v912_v34 }
 0x379   : > { %v1789_v28 = vpop.eup %1788  ;;  %v964_v47 = vmul.f32 1.442695, %v2193_v40 }
 0x37a   : > { %v982_v21 = vsel %vm879_vm3, %v1789_v28, 0.0  ;;  %v1791_v30 = vpop.eup %1790  ;;  %v1220_v33 = vmul.f32 %v1789_v28, %v2174_v20  ;;  %v906_v42 = vpop.xlane.xlu0 %905 }
 0x37b   : > { %983 = vadd.xlane.f32.xlu0 %v982_v21  ;;  %v976_v32 = vsel %vm879_vm3, %v1791_v30, 0.0  ;;  %v1218_v37 = vmul.f32 %v1791_v30, %v2169_v16  ;;  %v2200_v52 = vsub.f32 %v2084_v45, %v906_v42  ;;  %1796 = vpow2.f32 %v964_v47 }
 0x37c   : > { %v1240_v35 = vsel %vm879_vm3, %v1220_v33, 0.0 }
 0x37d   : > { %v1234_v38 = vsel %vm879_vm3, %v1218_v37, 0.0  ;;  %v1793_v39 = vpop.eup %1792  ;;  %v960_v6 = vmul.f32 1.442695, %v2200_v52 }
 0x37e   : > { %v994_v44 = vsel %vm879_vm3, %v1793_v39, 0.0  ;;  %v1224_v56 = vmul.f32 %v1793_v39, %v2179_v26  ;;  %v913_v39 = vsel %vm879_vm3, %v2130_v62, -inf }
 0x37f   : > { %977 = vadd.xlane.f32.xlu0 %v976_v32  ;;  %1798 = vpow2.f32 %v960_v6  ;;  %v2238_v6 = vadd.f32 %v2049_v19, %v2100_v51 }
 0x380   : > { %v1252_v15 = vsel %vm879_vm3, %v1224_v56, 0.0 }
 0x381   : > { %v1795_v46 = vpop.eup %1794 }
 0x382   : > { %v988_v55 = vsel %vm879_vm3, %v1795_v46, 0.0  ;;  %v1222_v17 = vmul.f32 %v1795_v46, %v2183_v29  ;;  %v2215_v32 = vpop.permute.xlu0 %1378  ;;  %v907_v46 = vsel %vm879_vm3, %v2095_v49, -inf }
 0x383   : > { %1241 = vadd.xlane.f32.xlu0 %v1240_v35  ;;  %2704 = vst [vmem:[#allocation3_spill] sm:$0xff] %v2215_v32 }
 0x384   : > { %v1246_v22 = vsel %vm879_vm3, %v1222_v17, 0.0  ;;  %v919_v17 = vsel %vm879_vm3, %v2238_v6, -inf }
 0x385   : > { %v1797_v24 = vpop.eup %1796 }
 0x386   : > { %v1006_v25 = vsel %vm879_vm3, %v1797_v24, 0.0  ;;  %v1228_v23 = vmul.f32 %v1797_v24, %v2193_v40 }
 0x387   : > { %1235 = vadd.xlane.f32.xlu0 %v1234_v38 }
 0x388   : > { %896 = vmax.xlane.f32.xlu1 %v895_v41  ;;  %v1264_v21 = vsel %vm879_vm3, %v1228_v23, 0.0 }
 0x389   : > { %v1799_v27 = vpop.eup %1798 }
 0x38a   : > { %v1000_v28 = vsel %vm879_vm3, %v1799_v27, 0.0  ;;  %v1226_v30 = vmul.f32 %v1799_v27, %v2200_v52 }
 0x38b   : > { %995 = vadd.xlane.f32.xlu0 %v994_v44  ;;  %v2230_v44 = vadd.f32 %v2098_v50, %v2049_v19 }
 0x38c   : > { %v1258_v31 = vsel %vm879_vm3, %v1226_v30, 0.0 }
 0x38f   : > { %989 = vadd.xlane.f32.xlu0 %v988_v55 }
 0x393   : > { %1253 = vadd.xlane.f32.xlu0 %v1252_v15  ;;  %v925_v15 = vsel %vm879_vm3, %v2230_v44, -inf }
 0x397   : > { %1247 = vadd.xlane.f32.xlu0 %v1246_v22  ;;  %v2245_v22 = vpop.permute.xlu1 %1348 }
 0x398   : > { %2705 = vst [vmem:[#allocation4_spill] sm:$0xff] %v2245_v22 }
 0x399   : > { %1373 = vperm.xlu1 %1707, %v2084_v45  }
 0x39b   : > { %1007 = vadd.xlane.f32.xlu0 %v1006_v25 }
 0x39f   : > { %1001 = vadd.xlane.f32.xlu0 %v1000_v28  ;;  %v891_v24 = vpop.xlane.xlu1 %890  ;;  %v2260_v28 = vsub.f32 %v2062_v36, %v2171_v18 }
 0x3a0   : > { %v2254_v25 = vsub.f32 %v2091_v48, %v891_v24 }
 0x3a2   : > { %v950_v23 = vmul.f32 1.442695, %v2254_v25 }
 0x3a3   : > { %1265 = vadd.xlane.f32.xlu0 %v1264_v21  ;;  %v2249_v19 = vpop.permute.xlu1 %1338  ;;  %v946_v21 = vmul.f32 1.442695, %v2260_v28 }
 0x3a7   : > { %1259 = vadd.xlane.f32.xlu0 %v1258_v31  ;;  %v2251_v51 = vpop.permute.xlu1 %1363 }
 0x3ab   : > { %v2256_v27 = vpop.permute.xlu1 %1353 }
 0x3af   : > { %v924_v45 = vpop.xlane.xlu0 %923 }
 0x3b0   : > { %v2218_v33 = vsub.f32 %v2105_v53, %v924_v45 }
 0x3b2   : > { %v972_v34 = vmul.f32 1.442695, %v2218_v33 }
 0x3b3   : > { %v918_v35 = vpop.xlane.xlu0 %917 }
 0x3b4   : > { %1800 = vpow2.f32 %v972_v34  ;;  %v2222_v37 = vsub.f32 %v2108_v54, %v918_v35 }
 0x3b6   : > { %v968_v38 = vmul.f32 1.442695, %v2222_v37 }
 0x3b8   : > { %1802 = vpow2.f32 %v968_v38 }
 0x3b9   : > { %1804 = vpow2.f32 %v950_v23 }
 0x3ba   : > { %1806 = vpow2.f32 %v946_v21 }
 0x3bd   : > { %914 = vmax.xlane.f32.xlu1 %v913_v39 }
 0x3be   : > { %v1801_v41 = vpop.eup %1800 }
 0x3bf   : > { %v1018_v42 = vsel %vm879_vm3, %v1801_v41, 0.0  ;;  %v1232_v56 = vmul.f32 %v1801_v41, %v2218_v33 }
 0x3c0   : > { %1019 = vadd.xlane.f32.xlu0 %v1018_v42 }
 0x3c1   : > { %908 = vmax.xlane.f32.xlu1 %v907_v46  ;;  %v1276_v50 = vsel %vm879_vm3, %v1232_v56, 0.0 }
 0x3c2   : > { %v1803_v47 = vpop.eup %1802 }
 0x3c3   : > { %v1012_v55 = vsel %vm879_vm3, %v1803_v47, 0.0  ;;  %v1230_v48 = vmul.f32 %v1803_v47, %v2222_v37  ;;  %v1805_v45 = vpop.eup %1804 }
 0x3c4   : > { %1013 = vadd.xlane.f32.xlu0 %v1012_v55  ;;  %v985_v18 = vsel %vm879_vm3, %v1805_v45, 0.0  ;;  %v1807_v35 = vpop.eup %1806  ;;  %v1221_v39 = vmul.f32 %v1805_v45, %v2254_v25 }
 0x3c5   : > { %926 = vmax.xlane.f32.xlu1 %v925_v15  ;;  %v1270_v36 = vsel %vm879_vm3, %v1230_v48, 0.0  ;;  %v979_v38 = vsel %vm879_vm3, %v1807_v35, 0.0  ;;  %v1219_v42 = vmul.f32 %v1807_v35, %v2260_v28 }
 0x3c6   : > { %v1243_v41 = vsel %vm879_vm3, %v1221_v39, 0.0 }
 0x3c7   : > { %v1237_v47 = vsel %vm879_vm3, %v1219_v42, 0.0 }
 0x3c8   : > { %1277 = vadd.xlane.f32.xlu0 %v1276_v50  ;;  %v1088_v50 = vlaneseq }
 0x3c9   : > { %920 = vmax.xlane.f32.xlu1 %v919_v17 }
 0x3ca   : > { %v2283_v21 = vand.u32 127, %v1088_v50 }
 0x3cc   : > { %vm1140_vm4 = vcmp.eq.s32.totalorder %v2283_v21, %v2119_v58  ;;  %vm1139_vm5 = vcmp.eq.s32.totalorder %v2283_v21, %v2115_v57  ;;  %vm1144_vm6 = vcmp.eq.s32.totalorder %v2283_v21, %v2135_v0  ;;  %vm1142_vm7 = vcmp.eq.s32.totalorder %v2283_v21, %v2127_v61 }
 0x3cd   : > { %vm1330_vm8 = vcmp.eq.s32.totalorder %v2283_v21, 0  ;;  %vm1427_vm9 = vcmp.eq.s32.totalorder %v2283_v21, 1  ;;  %vm1138_vm10 = vcmp.eq.s32.totalorder %v2283_v21, %v2137_v1  ;;  %vm1444_vm11 = vcmp.eq.s32.totalorder %v2283_v21, 2 }
 0x3ce   : > { %vm1148_vm12 = vcmp.eq.s32.totalorder %v2283_v21, %v2149_v7  ;;  %v1413_v61 = vsel %vm1330_vm8, %v2166_v14, 0.0  ;;  %vm1141_vm13 = vcmp.eq.s32.totalorder %v2283_v21, %v2125_v60  ;;  %vm1146_vm14 = vcmp.eq.s32.totalorder %v2283_v21, %v2143_v4 }
 0x3cf   : > { %vm1145_vm15 = vcmp.eq.s32.totalorder %v2283_v21, %v2139_v2  ;;  %vm1152_vm0 = vcmp.eq.s32.totalorder %v2283_v21, %v2161_v12  ;;  %vm1150_vm1 = vcmp.eq.s32.totalorder %v2283_v21, %v2153_v9  ;;  %vm1143_vm2 = vcmp.eq.s32.totalorder %v2283_v21, %v2133_v63 }
 0x3da   : > { %1383 = vperm.xlu1 %1707, %v2079_v43   ;;  %v2264_v43 = vpop.permute.xlu1 %1368 }
 0x3db   : > { %2706 = vst [vmem:[#allocation5_spill] sm:$0xff] %v2264_v43 }
 0x3de   : > { %1398 = vperm.xlu0 %1708, %v2238_v6  }
 0x3e0   : > { %v903_v30 = vpop.xlane.xlu1 %902 }
 0x3e1   : > { %v2267_v31 = vsub.f32 %v2122_v59, %v903_v30  ;;  %v2275_v59 = vpop.permute.xlu0 %1388 }
 0x3e2   : > { %2707 = vst [vmem:[#allocation6_spill] sm:$0xff] %v2275_v59 }
 0x3e3   : > { %v958_v34 = vmul.f32 1.442695, %v2267_v31 }
 0x3e4   : > { %v2281_v24 = vpop.permute.xlu1 %1358 }
 0x3e5   : > { %1808 = vpow2.f32 %v958_v34  ;;  %2708 = vst [vmem:[#allocation7_spill] sm:$0xff] %v2281_v24 }
 0x3ef   : > { %v1809_v55 = vpop.eup %1808 }
 0x3f0   : > { %v997_v15 = vsel %vm879_vm3, %v1809_v55, 0.0 }
 0x3fd   : > { %1271 = vadd.xlane.f32.xlu0 %v1270_v36 }
 0x3fe   : > { %986 = vadd.xlane.f32.xlu1 %v985_v18 }
 0x402   : > { %980 = vadd.xlane.f32.xlu1 %v979_v38 }
 0x406   : > { %1244 = vadd.xlane.f32.xlu1 %v1243_v41 }
 0x408   : > { %v984_v46 = vpop.xlane.xlu0 %983 }
 0x409   : > { %1810 = vlog2.f32 %v984_v46 }
 0x40a   : > { %1812 = vrcp.f32 %v984_v46  ;;  %1238 = vadd.xlane.f32.xlu1 %v1237_v47 }
 0x40c   : > { %v978_v56 = vpop.xlane.xlu0 %977 }
 0x40d   : > { %1814 = vlog2.f32 %v978_v56 }
 0x40e   : > { %1816 = vrcp.f32 %v978_v56  ;;  %998 = vadd.xlane.f32.xlu1 %v997_v15 }
 0x410   : > { %v1242_v17 = vpop.xlane.xlu0 %1241 }
 0x413   : > { %v1811_v23 = vpop.eup %1810 }
 0x414   : > { %v1813_v30 = vpop.eup %1812  ;;  %v2285_v48 = vmul.f32 0.6931472, %v1811_v23  ;;  %v1236_v45 = vpop.xlane.xlu0 %1235 }
 0x415   : > { %v2287_v34 = vmul.f32 %v1813_v30, %v1242_v17  ;;  %v897_v36 = vpop.xlane.xlu1 %896 }
 0x416   : > { %v2290_v18 = vsub.f32 %v2159_v11, %v897_v36  ;;  %v1058_v35 = vsub.f32 %v2174_v20, %v2285_v48 }
 0x417   : > { %v1815_v38 = vpop.eup %1814  ;;  %v2716_v7 = vsub.f32 %v2285_v48, %v2287_v34 }
 0x418   : > { %v1817_v41 = vpop.eup %1816  ;;  %v2298_v42 = vmul.f32 0.6931472, %v1815_v38  ;;  %v954_v46 = vmul.f32 1.442695, %v2290_v18  ;;  %v996_v47 = vpop.xlane.xlu0 %995  ;;  %v1156_v56 = vsel %vm1140_vm4, %v1058_v35, 0.0  ;;  %v1225_v38 = vmul.f32 %v1809_v55, %v2267_v31 }
 0x419   : > { %v2301_v15 = vmul.f32 %v1817_v41, %v1236_v45  ;;  %1818 = vlog2.f32 %v996_v47  ;;  %v1176_v11 = vsel %vm879_vm3, %v1156_v56, 0.0  ;;  %vm1149_vm4 = vcmp.eq.s32.totalorder %v2283_v21, %v2145_v5 }
 0x41a   : > { %1820 = vpow2.f32 %v954_v46  ;;  %1177 = vadd.xlane.f32.xlu0 %v1176_v11 }
 0x41b   : > { %2709 = vst [vmem:[#allocation8_spill] sm:$0xff] %v2301_v15  ;;  %1822 = vrcp.f32 %v996_v47 }
 0x41c   : > { %v990_v20 = vpop.xlane.xlu0 %989 }
 0x41d   : > { %1824 = vlog2.f32 %v990_v20 }
 0x41e   : > { %1826 = vrcp.f32 %v990_v20 }
 0x420   : > { %v1254_v50 = vpop.xlane.xlu0 %1253 }
 0x423   : > { %v1819_v17 = vpop.eup %1818 }
 0x424   : > { %v1821_v23 = vpop.eup %1820  ;;  %v2306_v30 = vmul.f32 0.6931472, %v1819_v17  ;;  %v1248_v36 = vpop.xlane.xlu0 %1247  ;;  %v1255_v17 = vsel %vm879_vm3, %v1225_v38, 0.0 }
 0x425   : > { %v1823_v45 = vpop.eup %1822  ;;  %v991_v35 = vsel %vm879_vm3, %v1821_v23, 0.0  ;;  %v1223_v39 = vmul.f32 %v1821_v23, %v2290_v18 }
 0x426   : > { %v2310_v41 = vmul.f32 %v1823_v45, %v1254_v50  ;;  %992 = vadd.xlane.f32.xlu1 %v991_v35 }
 0x427   : > { %v1825_v46 = vpop.eup %1824  ;;  %v1249_v45 = vsel %vm879_vm3, %v1223_v39, 0.0 }
 0x428   : > { %v1827_v56 = vpop.eup %1826  ;;  %v2314_v11 = vmul.f32 0.6931472, %v1825_v46  ;;  %v1008_v20 = vpop.xlane.xlu0 %1007 }
 0x429   : > { %v2316_v58 = vmul.f32 %v1827_v56, %v1248_v36  ;;  %1828 = vlog2.f32 %v1008_v20 }
 0x42a   : > { %1830 = vrcp.f32 %v1008_v20  ;;  %1256 = vadd.xlane.f32.xlu1 %v1255_v17 }
 0x42c   : > { %v1002_v50 = vpop.xlane.xlu0 %1001 }
 0x42d   : > { %1832 = vlog2.f32 %v1002_v50 }
 0x42e   : > { %1834 = vrcp.f32 %v1002_v50  ;;  %1250 = vadd.xlane.f32.xlu1 %v1249_v45  ;;  %v2335_v50 = vpop.permute.xlu1 %1373 }
 0x42f   : > { %2712 = vst [vmem:[#allocation11_spill] sm:$0xff] %v2335_v50 }
 0x430   : > { %v1266_v35 = vpop.xlane.xlu0 %1265 }
 0x433   : > { %v1829_v46 = vpop.eup %1828 }
 0x434   : > { %v1831_v36 = vpop.eup %1830  ;;  %v2323_v56 = vmul.f32 0.6931472, %v1829_v46  ;;  %v1260_v55 = vpop.xlane.xlu0 %1259 }
 0x435   : > { %v2325_v47 = vmul.f32 %v1831_v36, %v1266_v35 }
 0x437   : > { %2710 = vst [vmem:[#allocation9_spill] sm:$0xff] %v2325_v47  ;;  %v1833_v38 = vpop.eup %1832 }
 0x438   : > { %v1835_v20 = vpop.eup %1834  ;;  %v2329_v17 = vmul.f32 0.6931472, %v1833_v38 }
 0x439   : > { %v2331_v32 = vmul.f32 %v1835_v20, %v1260_v55 }
 0x43b   : > { %2711 = vst [vmem:[#allocation10_spill] sm:$0xff] %v2331_v32 }
 0x44a   : > { %v915_v45 = vpop.xlane.xlu1 %914 }
 0x44b   : > { %v2338_v46 = vsub.f32 %v2130_v62, %v915_v45 }
 0x44d   : > { %v966_v35 = vmul.f32 1.442695, %v2338_v46  ;;  %v1020_v36 = vpop.xlane.xlu0 %1019 }
 0x44e   : > { %1836 = vlog2.f32 %v1020_v36  ;;  %v909_v23 = vpop.xlane.xlu1 %908 }
 0x44f   : > { %1838 = vpow2.f32 %v966_v35  ;;  %v2342_v38 = vsub.f32 %v2095_v49, %v909_v23 }
 0x450   : > { %1840 = vrcp.f32 %v1020_v36 }
 0x451   : > { %v962_v55 = vmul.f32 1.442695, %v2342_v38  ;;  %v1014_v39 = vpop.xlane.xlu0 %1013 }
 0x452   : > { %v927_v20 = vpop.xlane.xlu1 %926 }
 0x453   : > { %1842 = vpow2.f32 %v962_v55  ;;  %v2346_v59 = vsub.f32 %v2230_v44, %v927_v20 }
 0x455   : > { %v974_v43 = vmul.f32 1.442695, %v2346_v59  ;;  %v1278_v23 = vpop.xlane.xlu0 %1277 }
 0x456   : > { %v921_v62 = vpop.xlane.xlu1 %920 }
 0x457   : > { %v2352_v35 = vsub.f32 %v2238_v6, %v921_v62  ;;  %1844 = vpow2.f32 %v974_v43 }
 0x458   : > { %v1837_v45 = vpop.eup %1836 }
 0x459   : > { %v1839_v24 = vpop.eup %1838  ;;  %v2349_v32 = vmul.f32 0.6931472, %v1837_v45  ;;  %v970_v22 = vmul.f32 1.442695, %v2352_v35 }
 0x45a   : > { %v1841_v49 = vpop.eup %1840  ;;  %v1009_v36 = vsel %vm879_vm3, %v1839_v24, 0.0  ;;  %v1229_v47 = vmul.f32 %v1839_v24, %v2338_v46  ;;  %v2370_v24 = vpop.permute.xlu1 %1383 }
 0x45b   : > { %v2355_v50 = vmul.f32 %v1841_v49, %v1278_v23  ;;  %1010 = vadd.xlane.f32.xlu1 %v1009_v36  ;;  %1846 = vpow2.f32 %v970_v22  ;;  %2715 = vst [vmem:[#allocation14_spill] sm:$0xff] %v2370_v24 }
 0x45c   : > { %v1267_v6 = vsel %vm879_vm3, %v1229_v47, 0.0  ;;  %1848 = vlog2.f32 %v1014_v39 }
 0x45d   : > { %2713 = vst [vmem:[#allocation12_spill] sm:$0xff] %v2355_v50  ;;  %v1843_v55 = vpop.eup %1842  ;;  %1850 = vrcp.f32 %v1014_v39  ;;  %v2368_v22 = vpop.permute.xlu0 %1398 }
 0x45e   : > { %v1003_v45 = vsel %vm879_vm3, %v1843_v55, 0.0  ;;  %v1227_v62 = vmul.f32 %v1843_v55, %v2342_v38  ;;  %2714 = vst [vmem:[#allocation13_spill] sm:$0xff] %v2368_v22 }
 0x45f   : > { %1004 = vadd.xlane.f32.xlu1 %v1003_v45 }
 0x460   : > { %v1261_v49 = vsel %vm879_vm3, %v1227_v62, 0.0 }
 0x461   : > { %v1845_v23 = vpop.eup %1844 }
 0x462   : > { %v1021_v43 = vsel %vm879_vm3, %v1845_v23, 0.0 }
 0x463   : > { %1268 = vadd.xlane.f32.xlu1 %v1267_v6 }
 0x465   : > { %v1847_v36 = vpop.eup %1846 }
 0x466   : > { %v1015_v20 = vsel %vm879_vm3, %v1847_v36, 0.0  ;;  %v1849_v47 = vpop.eup %1848  ;;  %v1231_v57 = vmul.f32 %v1847_v36, %v2352_v35 }
 0x467   : > { %1262 = vadd.xlane.f32.xlu1 %v1261_v49  ;;  %v1851_v55 = vpop.eup %1850  ;;  %v2372_v6 = vmul.f32 0.6931472, %v1849_v47 }
 0x46b   : > { %1022 = vadd.xlane.f32.xlu1 %v1021_v43 }
 0x46f   : > { %1016 = vadd.xlane.f32.xlu1 %v1015_v20 }
 0x480   : > { %1393 = vperm.xlu1 %1707, %v2108_v54  }
 0x48a   : > { %v1272_v45 = vpop.xlane.xlu0 %1271 }
 0x48b   : > { %v2374_v62 = vmul.f32 %v1851_v55, %v1272_v45  ;;  %v987_v49 = vpop.xlane.xlu1 %986 }
 0x48c   : > { %1852 = vlog2.f32 %v987_v49 }
 0x48d   : > { %1854 = vrcp.f32 %v987_v49 }
 0x48f   : > { %v981_v39 = vpop.xlane.xlu1 %980 }
 0x490   : > { %1856 = vlog2.f32 %v981_v39 }
 0x491   : > { %1858 = vrcp.f32 %v981_v39 }
 0x493   : > { %v1245_v54 = vpop.xlane.xlu1 %1244 }
 0x496   : > { %v1853_v43 = vpop.eup %1852 }
 0x497   : > { %v1855_v50 = vpop.eup %1854  ;;  %v2378_v22 = vmul.f32 0.6931472, %v1853_v43  ;;  %v1239_v15 = vpop.xlane.xlu1 %1238  ;;  %v1062_v43 = vsub.f32 %v2179_v26, %v2306_v30  ;;  %v1060_v26 = vsub.f32 %v2183_v29, %v2314_v11  ;;  %v1066_v29 = vsub.f32 %v2193_v40, %v2323_v56 }
 0x498   : > { %v2380_v24 = vmul.f32 %v1855_v50, %v1245_v54  ;;  %v1273_v40 = vsel %vm879_vm3, %v1231_v57, 0.0 }
 0x49a   : > { %v1857_v47 = vpop.eup %1856  ;;  %v1317_v55 = vsub.f32 %v2378_v22, %v2380_v24 }
 0x49b   : > { %v1859_v45 = vpop.eup %1858  ;;  %v2384_v13 = vmul.f32 0.6931472, %v1857_v47  ;;  %v999_v20 = vpop.xlane.xlu1 %998  ;;  %v1233_v47 = vmul.f32 %v1845_v23, %v2346_v59  ;;  %v1158_v23 = vsel %vm1142_vm7, %v1060_v26, 0.0  ;;  %v1064_v26 = vsub.f32 %v2200_v52, %v2329_v17 }
 0x49c   : > { %v2386_v49 = vmul.f32 %v1859_v45, %v1239_v15  ;;  %1860 = vlog2.f32 %v999_v20  ;;  %v1160_v45 = vsel %vm1144_vm6, %v1062_v43, 0.0  ;;  %v1070_v52 = vsub.f32 %v2218_v33, %v2349_v32 }
 0x49d   : > { %v1057_v39 = vsub.f32 %v2260_v28, %v2384_v13  ;;  %v1279_v28 = vsel %vm879_vm3, %v1233_v47, 0.0  ;;  %v1188_v0 = vsel %vm879_vm3, %v1160_v45, 0.0  ;;  %v1182_v47 = vsel %vm879_vm3, %v1158_v23, 0.0 }
 0x49e   : > { %v1315_v50 = vsub.f32 %v2384_v13, %v2386_v49  ;;  %v1164_v45 = vsel %vm1148_vm12, %v1066_v29, 0.0  ;;  %1862 = vrcp.f32 %v999_v20  ;;  %v1162_v57 = vsel %vm1146_vm14, %v1064_v26, 0.0 }
 0x49f   : > { %v1155_v54 = vsel %vm1139_vm5, %v1057_v39, 0.0  ;;  %v1056_v39 = vsub.f32 %v2169_v16, %v2298_v42  ;;  %v1194_v4 = vsel %vm879_vm3, %v1162_v57, 0.0  ;;  %v1068_v20 = vsub.f32 %v2222_v37, %v2372_v6 }
 0x4a0   : > { %v1173_v15 = vsel %vm879_vm3, %v1155_v54, 0.0  ;;  %vm1147_vm5 = vcmp.eq.s32.totalorder %v2283_v21, %v2141_v3  ;;  %vm1153_vm6 = vcmp.eq.s32.totalorder %v2283_v21, %v2155_v10  ;;  %vm1151_vm7 = vcmp.eq.s32.totalorder %v2283_v21, %v2151_v8 }
 0x4a1   : > { %1174 = vadd.xlane.f32.xlu0 %v1173_v15  ;;  %v1154_v1 = vsel %vm1138_vm10, %v1056_v39, 0.0  ;;  %v1059_v15 = vsub.f32 %v2254_v25, %v2378_v22  ;;  %v1200_v25 = vsel %vm879_vm3, %v1164_v45, 0.0  ;;  %v1166_v12 = vsel %vm1150_vm1, %v1068_v20, 0.0 }
 0x4a2   : > { %v2717_v49 = vsub.f32 %v2306_v30, %v2310_v41  ;;  %v2718_v41 = vsub.f32 %v2314_v11, %v2316_v58  ;;  %v2721_v58 = vld [vmem:[#allocation8_spill] sm:$0xff] }
 0x4a3   : > { %v1157_v48 = vsel %vm1141_vm13, %v1059_v15, 0.0  ;;  %v2722_v11 = vsub.f32 %v2298_v42, %v2721_v58 }
 0x4a4   : > { %1280 = vadd.xlane.f32.xlu1 %v1279_v28  ;;  %v1170_v28 = vsel %vm879_vm3, %v1154_v1, 0.0  ;;  %v1179_v60 = vsel %vm879_vm3, %v1157_v48, 0.0 }
 0x4a5   : > { %1189 = vadd.xlane.f32.xlu0 %v1188_v0 }
 0x4a6   : > { %v1861_v43 = vpop.eup %1860 }
 0x4a7   : > { %v1178_v16 = vpop.xlane.xlu0 %1177  ;;  %v2429_v36 = vmul.f32 0.6931472, %v1861_v43 }
 0x4a8   : > { %v1430_v54 = vsel %vm1427_vm9, %v1178_v16, %v1413_v61  ;;  %1274 = vadd.xlane.f32.xlu1 %v1273_v40  ;;  %v1863_v23 = vpop.eup %1862  ;;  %v1206_v61 = vsel %vm879_vm3, %v1166_v12, 0.0 }
 0x4a9   : > { %v1447_v14 = vsel %vm1444_vm11, %v2716_v7, %v1430_v54  ;;  %1183 = vadd.xlane.f32.xlu0 %v1182_v47  ;;  %v1063_v34 = vsub.f32 %v2267_v31, %v2429_v36  ;;  %v1168_v31 = vsel %vm1152_vm0, %v1070_v52, 0.0 }
 0x4aa   : > { %1463 = vst [vmem:[%s2421_s18 + $0x10] sm:$0xff] %v1447_v14  ;;  %v1212_v2 = vsel %vm879_vm3, %v1168_v31, 0.0 }
 0x4ab   : > { %v1161_v39 = vsel %vm1145_vm15, %v1063_v34, 0.0 }
 0x4ac   : > { %1171 = vadd.xlane.f32.xlu1 %v1170_v28  ;;  %v1191_v33 = vsel %vm879_vm3, %v1161_v39, 0.0 }
 0x4ad   : > { %1201 = vadd.xlane.f32.xlu0 %v1200_v25 }
 0x4b0   : > { %1180 = vadd.xlane.f32.xlu1 %v1179_v60 }
 0x4b1   : > { %1195 = vadd.xlane.f32.xlu0 %v1194_v4 }
 0x4b3   : > { %v993_v0 = vpop.xlane.xlu1 %992 }
 0x4b4   : > { %1864 = vlog2.f32 %v993_v0  ;;  %1192 = vadd.xlane.f32.xlu1 %v1191_v33 }
 0x4b5   : > { %1866 = vrcp.f32 %v993_v0  ;;  %1213 = vadd.xlane.f32.xlu0 %v1212_v2 }
 0x4b7   : > { %v1257_v29 = vpop.xlane.xlu1 %1256 }
 0x4b8   : > { %v2466_v43 = vmul.f32 %v1863_v23, %v1257_v29 }
 0x4b9   : > { %1207 = vadd.xlane.f32.xlu0 %v1206_v61 }
 0x4ba   : > { %v1321_v37 = vsub.f32 %v2429_v36, %v2466_v43  ;;  %v2731_v36 = vld [vmem:[#allocation7_spill] sm:$0xff] }
 0x4bb   : > { %v1251_v1 = vpop.xlane.xlu1 %1250  ;;  %v1416_v43 = vsel %vm1330_vm8, %v2731_v36, 0.0 }
 0x4be   : > { %v1865_v16 = vpop.eup %1864 }
 0x4bf   : > { %v1867_v40 = vpop.eup %1866  ;;  %v2471_v9 = vmul.f32 0.6931472, %v1865_v16 }
 0x4c0   : > { %v2473_v54 = vmul.f32 %v1867_v40, %v1251_v1 }
 0x4c1   : > { %v1061_v47 = vsub.f32 %v2290_v18, %v2471_v9 }
 0x4c2   : > { %v1319_v15 = vsub.f32 %v2471_v9, %v2473_v54  ;;  %v2733_v9 = vld [vmem:[#allocation3_spill] sm:$0xff] }
 0x4c3   : > { %v1159_v7 = vsel %vm1143_vm2, %v1061_v47, 0.0  ;;  %v1420_v54 = vsel %vm1330_vm8, %v2733_v9, 0.0 }
 0x4c4   : > { %v1185_v14 = vsel %vm879_vm3, %v1159_v7, 0.0  ;;  %v1412_v7 = vsel %vm1330_vm8, %v2249_v19, 0.0 }
 0x4c5   : > { %1186 = vadd.xlane.f32.xlu1 %v1185_v14 }
 0x4cf   : > { %1408 = vperm.xlu0 %1708, %v2230_v44  }
 0x4e8   : > { %v1011_v45 = vpop.xlane.xlu1 %1010 }
 0x4e9   : > { %1868 = vlog2.f32 %v1011_v45 }
 0x4ea   : > { %1870 = vrcp.f32 %v1011_v45 }
 0x4ec   : > { %v1005_v26 = vpop.xlane.xlu1 %1004 }
 0x4ed   : > { %1872 = vlog2.f32 %v1005_v26 }
 0x4ee   : > { %1874 = vrcp.f32 %v1005_v26  ;;  %v1417_v26 = vsel %vm1330_vm8, %v2251_v51, 0.0 }
 0x4f0   : > { %v1269_v28 = vpop.xlane.xlu1 %1268 }
 0x4f3   : > { %v1869_v18 = vpop.eup %1868 }
 0x4f4   : > { %v1871_v25 = vpop.eup %1870  ;;  %v2483_v48 = vmul.f32 0.6931472, %v1869_v18  ;;  %v1263_v63 = vpop.xlane.xlu1 %1262 }
 0x4f5   : > { %v2485_v34 = vmul.f32 %v1871_v25, %v1269_v28 }
 0x4f6   : > { %v1067_v57 = vsub.f32 %v2338_v46, %v2483_v48 }
 0x4f7   : > { %v1873_v52 = vpop.eup %1872  ;;  %v1325_v44 = vsub.f32 %v2483_v48, %v2485_v34 }
 0x4f8   : > { %v1875_v60 = vpop.eup %1874  ;;  %v2493_v4 = vmul.f32 0.6931472, %v1873_v52  ;;  %v1023_v39 = vpop.xlane.xlu1 %1022  ;;  %v1165_v31 = vsel %vm1149_vm4, %v1067_v57, 0.0 }
 0x4f9   : > { %v2495_v20 = vmul.f32 %v1875_v60, %v1263_v63  ;;  %1876 = vlog2.f32 %v1023_v39  ;;  %v1203_v0 = vsel %vm879_vm3, %v1165_v31, 0.0  ;;  %v1415_v63 = vsel %vm1330_vm8, %v2256_v27, 0.0  ;;  %v2719_v31 = vld [vmem:[#allocation2_spill] sm:$0xff] }
 0x4fa   : > { %1204 = vadd.xlane.f32.xlu1 %v1203_v0  ;;  %v1065_v46 = vsub.f32 %v2342_v38, %v2493_v4  ;;  %v1411_v27 = vsel %vm1330_vm8, %v2719_v31, 0.0 }
 0x4fb   : > { %v1323_v5 = vsub.f32 %v2493_v4, %v2495_v20  ;;  %v2734_v4 = vld [vmem:[#allocation13_spill] sm:$0xff] }
 0x4fc   : > { %v1017_v33 = vpop.xlane.xlu1 %1016  ;;  %v1163_v2 = vsel %vm1147_vm5, %v1065_v46, 0.0  ;;  %v2720_v46 = vld [vmem:[#allocation14_spill] sm:$0xff]  ;;  %v1424_v20 = vsel %vm1330_vm8, %v2734_v4, 0.0 }
 0x4fd   : > { %1878 = vlog2.f32 %v1017_v33  ;;  %v1197_v12 = vsel %vm879_vm3, %v1163_v2, 0.0 }
 0x4fe   : > { %1198 = vadd.xlane.f32.xlu1 %v1197_v12  ;;  %1880 = vrcp.f32 %v1023_v39 }
 0x4ff   : > { %1882 = vrcp.f32 %v1017_v33  ;;  %v1421_v33 = vsel %vm1330_vm8, %v2720_v46, 0.0 }
 0x500   : > { %v1394_v10 = vpop.permute.xlu1 %1393 }
 0x503   : > { %v1877_v23 = vpop.eup %1876 }
 0x504   : > { %v2505_v29 = vmul.f32 0.6931472, %v1877_v23 }
 0x506   : > { %v1071_v61 = vsub.f32 %v2346_v59, %v2505_v29 }
 0x507   : > { %v1879_v16 = vpop.eup %1878 }
 0x508   : > { %v2511_v3 = vmul.f32 0.6931472, %v1879_v16  ;;  %v1169_v38 = vsel %vm1153_vm6, %v1071_v61, 0.0  ;;  %v1881_v45 = vpop.eup %1880  ;;  %v2723_v16 = vld [vmem:[#allocation9_spill] sm:$0xff] }
 0x509   : > { %v1215_v40 = vsel %vm879_vm3, %v1169_v38, 0.0  ;;  %v1883_v25 = vpop.eup %1882 }
 0x50a   : > { %1216 = vadd.xlane.f32.xlu1 %v1215_v40  ;;  %v1069_v1 = vsub.f32 %v2352_v35, %v2511_v3  ;;  %v2725_v40 = vld [vmem:[#allocation4_spill] sm:$0xff] }
 0x50c   : > { %v1167_v47 = vsel %vm1151_vm7, %v1069_v1, 0.0  ;;  %v1414_v1 = vsel %vm1330_vm8, %v2725_v40, 0.0 }
 0x50d   : > { %v1209_v59 = vsel %vm879_vm3, %v1167_v47, 0.0  ;;  %v2726_v47 = vld [vmem:[#allocation11_spill] sm:$0xff] }
 0x50e   : > { %1210 = vadd.xlane.f32.xlu1 %v1209_v59  ;;  %v1419_v59 = vsel %vm1330_vm8, %v2726_v47, 0.0 }
 0x51f   : > { %1403 = vperm.xlu1 %1707, %v2105_v53  }
 0x52e   : > { %v1175_v14 = vpop.xlane.xlu0 %1174 }
 0x52f   : > { %v1429_v35 = vsel %vm1427_vm9, %v1175_v14, %v1412_v7 }
 0x530   : > { %v1446_v8 = vsel %vm1444_vm11, %v1315_v50, %v1429_v35 }
 0x531   : > { %1462 = vst [vmem:[%s2421_s18 + $0x8] sm:$0xff] %v1446_v8  ;;  %v1281_v53 = vpop.xlane.xlu1 %1280  ;;  %v2727_v8 = vld [vmem:[#allocation10_spill] sm:$0xff] }
 0x532   : > { %v2534_v28 = vmul.f32 %v1881_v45, %v1281_v53  ;;  %v1190_v19 = vpop.xlane.xlu0 %1189  ;;  %v2728_v45 = vsub.f32 %v2329_v17, %v2727_v8 }
 0x533   : > { %v1434_v18 = vsel %vm1427_vm9, %v1190_v19, %v1417_v26  ;;  %v2729_v26 = vld [vmem:[#allocation5_spill] sm:$0xff] }
 0x534   : > { %v1329_v13 = vsub.f32 %v2505_v29, %v2534_v28  ;;  %v1451_v50 = vsel %vm1444_vm11, %v2717_v49, %v1434_v18  ;;  %v1418_v19 = vsel %vm1330_vm8, %v2729_v26, 0.0  ;;  %v1423_v18 = vsel %vm1330_vm8, %v1394_v10, 0.0 }
 0x535   : > { %1467 = vst [vmem:[%s2421_s18 + $0x30] sm:$0xff] %v1451_v50  ;;  %v1275_v51 = vpop.xlane.xlu1 %1274 }
 0x536   : > { %v2549_v57 = vmul.f32 %v1883_v25, %v1275_v51  ;;  %v1184_v52 = vpop.xlane.xlu0 %1183  ;;  %v2730_v25 = vsub.f32 %v2372_v6, %v2374_v62  ;;  %v2732_v6 = vld [vmem:[#allocation6_spill] sm:$0xff] }
 0x537   : > { %v1432_v60 = vsel %vm1427_vm9, %v1184_v52, %v1415_v63  ;;  %v1422_v62 = vsel %vm1330_vm8, %v2732_v6, 0.0 }
 0x538   : > { %v1327_v30 = vsub.f32 %v2511_v3, %v2549_v57  ;;  %v1449_v39 = vsel %vm1444_vm11, %v2718_v41, %v1432_v60  ;;  %v2724_v3 = vsub.f32 %v2323_v56, %v2723_v16 }
 0x539   : > { %1465 = vst [vmem:[%s2421_s18 + $0x20] sm:$0xff] %v1449_v39  ;;  %v1172_v0 = vpop.xlane.xlu1 %1171 }
 0x53a   : > { %v1428_v2 = vsel %vm1427_vm9, %v1172_v0, %v1411_v27  ;;  %v1202_v12 = vpop.xlane.xlu0 %1201 }
 0x53b   : > { %v1445_v23 = vsel %vm1444_vm11, %v2722_v11, %v1428_v2  ;;  %v1438_v61 = vsel %vm1427_vm9, %v1202_v12, %v1421_v33 }
 0x53c   : > { %1461 = vst [vmem:[%s2421_s18] sm:$0xff] %v1445_v23  ;;  %v1455_v38 = vsel %vm1444_vm11, %v2724_v3, %v1438_v61 }
 0x53d   : > { %1471 = vst [vmem:[%s2421_s18 + $0x50] sm:$0xff] %v1455_v38  ;;  %v1181_v42 = vpop.xlane.xlu1 %1180 }
 0x53e   : > { %v1431_v7 = vsel %vm1427_vm9, %v1181_v42, %v1414_v1  ;;  %v1196_v14 = vpop.xlane.xlu0 %1195 }
 0x53f   : > { %v1448_v56 = vsel %vm1444_vm11, %v1317_v55, %v1431_v7  ;;  %v1436_v35 = vsel %vm1427_vm9, %v1196_v14, %v1419_v59 }
 0x540   : > { %1464 = vst [vmem:[%s2421_s18 + $0x18] sm:$0xff] %v1448_v56  ;;  %v1453_v53 = vsel %vm1444_vm11, %v2728_v45, %v1436_v35 }
 0x541   : > { %1469 = vst [vmem:[%s2421_s18 + $0x40] sm:$0xff] %v1453_v53  ;;  %v1193_v22 = vpop.xlane.xlu1 %1192 }
 0x542   : > { %v1435_v24 = vsel %vm1427_vm9, %v1193_v22, %v1418_v19  ;;  %v1214_v55 = vpop.xlane.xlu0 %1213 }
 0x543   : > { %v1452_v17 = vsel %vm1444_vm11, %v1321_v37, %v1435_v24 }
 0x544   : > { %1468 = vst [vmem:[%s2421_s18 + $0x38] sm:$0xff] %v1452_v17 }
 0x546   : > { %v1208_v49 = vpop.xlane.xlu0 %1207 }
 0x547   : > { %v1440_v50 = vsel %vm1427_vm9, %v1208_v49, %v1423_v18 }
 0x548   : > { %v1457_v51 = vsel %vm1444_vm11, %v2730_v25, %v1440_v50 }
 0x549   : > { %1473 = vst [vmem:[%s2421_s18 + $0x60] sm:$0xff] %v1457_v51 }
 0x54e   : > { %v1409_v48 = vpop.permute.xlu0 %1408 }
 0x54f   : > { %v1426_v34 = vsel %vm1330_vm8, %v1409_v48, 0.0 }
 0x552   : > { %v1187_v37 = vpop.xlane.xlu1 %1186 }
 0x553   : > { %v1433_v10 = vsel %vm1427_vm9, %v1187_v37, %v1416_v43 }
 0x554   : > { %v1450_v63 = vsel %vm1444_vm11, %v1319_v15, %v1433_v10 }
 0x555   : > { %1466 = vst [vmem:[%s2421_s18 + $0x28] sm:$0xff] %v1450_v63 }
 0x587   : > { %v1205_v57 = vpop.xlane.xlu1 %1204 }
 0x588   : > { %v1439_v52 = vsel %vm1427_vm9, %v1205_v57, %v1422_v62 }
 0x589   : > { %v1456_v60 = vsel %vm1444_vm11, %v1325_v44, %v1439_v52 }
 0x58a   : > { %1472 = vst [vmem:[%s2421_s18 + $0x58] sm:$0xff] %v1456_v60 }
 0x58b   : > { %v1199_v15 = vpop.xlane.xlu1 %1198 }
 0x58c   : > { %v1437_v41 = vsel %vm1427_vm9, %v1199_v15, %v1420_v54 }
 0x58d   : > { %v1454_v39 = vsel %vm1444_vm11, %v1323_v5, %v1437_v41 }
 0x58e   : > { %1470 = vst [vmem:[%s2421_s18 + $0x48] sm:$0xff] %v1454_v39 }
 0x597   : > { %v1217_v44 = vpop.xlane.xlu1 %1216 }
 0x598   : > { %v1443_v31 = vsel %vm1427_vm9, %v1217_v44, %v1426_v34 }
 0x599   : > { %v1460_v27 = vsel %vm1444_vm11, %v1329_v13, %v1443_v31  ;;  %v2735_v13 = vld [vmem:[#allocation12_spill] sm:$0xff] }
 0x59a   : > { %1476 = vst [vmem:[%s2421_s18 + $0x78] sm:$0xff] %v1460_v27  ;;  %v2736_v2 = vsub.f32 %v2349_v32, %v2735_v13 }
 0x59b   : > { %v1211_v5 = vpop.xlane.xlu1 %1210 }
 0x59c   : > { %v1441_v0 = vsel %vm1427_vm9, %v1211_v5, %v1424_v20 }
 0x59d   : > { %v1458_v46 = vsel %vm1444_vm11, %v1327_v30, %v1441_v0 }
 0x59e   : > { %1474 = vst [vmem:[%s2421_s18 + $0x68] sm:$0xff] %v1458_v46 }
 0x59f   : > { %v1404_v33 = vpop.permute.xlu1 %1403 }
 0x5a0   : > { %v1425_v29 = vsel %vm1330_vm8, %v1404_v33, 0.0 }
 0x5a1   : > { %v1442_v28 = vsel %vm1427_vm9, %v1214_v55, %v1425_v29 }
 0x5a2   : > { %v1459_v12 = vsel %vm1444_vm11, %v2736_v2, %v1442_v28 }
 0x5a3   : > { %1475 = vst [vmem:[%s2421_s18 + $0x70] sm:$0xff] %v1459_v12 }
 0x5a4 PF: > { %s18_s27 = sadd.s32 1, %s1890_s27  }
 0x5a5   : > { %p15_p4 = scmp.ge.s32.totalorder %s18_s27, 6  }
 0x5a7   :  { %17 = sbr.rel (!%p15_p4) target bundleno = 1 (0x1), region = 85 }

</bundles_post_ra>
